<compile_context>
chip_gen: v6e
topology: v6e:2x2x1
jax: 0.10.0
libtpu: 0.0.40
codegen_flags: <defaults>
</compile_context>

<pallas_src>
import functools

import jax
import jax.numpy as jnp
from jax import lax
from jax.experimental import pallas as pl
from jax.experimental.pallas import tpu as pltpu

NUM_CLASSES = 10
CLASS_PAD = 128     # lane-dense padded class dim
STEM_K_PAD = 16     # 9 patch taps (3x3, Cin=1) padded to 16
STEM_N_PAD = 128    # 64 stem channels padded to 128 lanes
FEAT_C = 1024       # backbone feature channels (matches fc in_features)
ROWS_BUDGET = 2048  # target bb*tile_hw rows per grid step ((rows,1024) f32 ~ 8 MiB)


# ----------------------------- fused Pallas kernel ----------------------------

def _fused_mnist_kernel(inv_hw, bb, tile_hw,
                        p_ref, w1_ref, b1_ref, w2_ref, b2_ref, wfc_ref, bfc_ref,
                        o_ref, pool_acc):
    """grid = (num_bb, num_t): bb whole images per step, HW reduction tiled along t."""
    t = pl.program_id(1)

    @pl.when(t == 0)
    def _():
        pool_acc[...] = jnp.zeros_like(pool_acc)

    # Stage 1: 3x3 conv stem as one big im2col matmul over bb*tile_hw rows, ReLU.
    x = p_ref[...].reshape(bb * tile_hw, STEM_K_PAD)                # bf16
    f1 = jnp.dot(x, w1_ref[...], preferred_element_type=jnp.float32)
    f1 = jnp.maximum(f1 + b1_ref[...], 0.0)                         # (rows, 128) f32

    # Stage 2: 1x1 projection 64(pad 128) -> 1024, ReLU. bf16 MXU, f32 accumulate.
    f2 = jnp.dot(f1.astype(jnp.bfloat16), w2_ref[...],
                 preferred_element_type=jnp.float32)
    f2 = jnp.maximum(f2 + b2_ref[...], 0.0)                         # (rows, 1024) f32

    # Stage 3: per-image global-avg-pool folded into the tile loop (pooled *sum*).
    pool_acc[...] += jnp.sum(f2.reshape(bb, tile_hw, FEAT_C), axis=1)   # (bb, 1024)

    # Stage 4 (last HW tile only): batched fc head + exact softmax, lane-dense store.
    @pl.when(t == pl.num_programs(1) - 1)
    def _():
        pooled = pool_acc[...] * inv_hw                             # (bb, 1024) f32
        logits = jnp.dot(pooled, wfc_ref[...],
                         preferred_element_type=jnp.float32) + bfc_ref[...]
        col = lax.broadcasted_iota(jnp.int32, logits.shape, 1)
        logits = jnp.where(col < NUM_CLASSES, logits, -1e30)        # mask padded classes
        m = jnp.max(logits, axis=-1, keepdims=True)
        e = jnp.exp(logits - m)
        o_ref[0] = e / jnp.sum(e, axis=-1, keepdims=True)           # (bb, 128)


# ----------------------------- glue (plain JAX) --------------------------------

def init_params(key):
    k1, k2, k3, k4, k5, k6 = jax.random.split(key, 6)
    w1 = 0.1 * jax.random.normal(k1, (9, 64), jnp.float32)          # conv stem 3x3, 1->64
    b1 = 0.1 * jax.random.normal(k2, (64,), jnp.float32)
    w2 = 0.05 * jax.random.normal(k3, (64, FEAT_C), jnp.float32)    # 1x1 proj 64->1024
    b2 = 0.05 * jax.random.normal(k4, (FEAT_C,), jnp.float32)
    wfc = 0.05 * jax.random.normal(k5, (FEAT_C, NUM_CLASSES), jnp.float32)
    bfc = 0.05 * jax.random.normal(k6, (NUM_CLASSES,), jnp.float32)

    # Zero-pad to MXU/lane-friendly shapes; padded lanes/rows are exact no-ops.
    return {
        "w1": jnp.zeros((STEM_K_PAD, STEM_N_PAD), jnp.bfloat16)
                 .at[:9, :64].set(w1.astype(jnp.bfloat16)),
        "b1": jnp.zeros((1, STEM_N_PAD), jnp.float32).at[0, :64].set(b1),
        "w2": jnp.zeros((STEM_N_PAD, FEAT_C), jnp.bfloat16)
                 .at[:64, :].set(w2.astype(jnp.bfloat16)),
        "b2": b2.reshape(1, FEAT_C),
        # fc weights kept in f32: the pooled vector stays f32 through the head.
        "wfc": jnp.zeros((FEAT_C, CLASS_PAD), jnp.float32)
                  .at[:, :NUM_CLASSES].set(wfc),
        "bfc": jnp.zeros((1, CLASS_PAD), jnp.float32).at[0, :NUM_CLASSES].set(bfc),
    }


def _choose_tiling(batch, hw):
    # HW tile: whole image per step for MNIST-size inputs; otherwise the largest
    # multiple-of-8 divisor of HW under the row budget.
    tile_hw = hw
    if hw > ROWS_BUDGET:
        for cand in range(ROWS_BUDGET - ROWS_BUDGET % 8, 7, -8):
            if hw % cand == 0:
                tile_hw = cand
                break
        # TODO(synk): if HW has no multiple-of-8 divisor under the budget this falls
        # back to the full image and may exceed the VMEM limit for very large inputs.
    num_t = hw // tile_hw

    # Batch packing: as many images per step as the row budget allows.
    bb = max(1, min(batch, ROWS_BUDGET // tile_hw))
    num_bb = -(-batch // bb)
    if num_bb < 2 and batch >= 2:
        # Keep >= 2 "parallel" grid steps so v7x's second TensorCore is not idle.
        bb = -(-batch // 2)
        num_bb = -(-batch // bb)
    return bb, num_bb, tile_hw, num_t


@jax.jit
def mnist_model_forward(x_nchw, params):
    B, C, H, W = x_nchw.shape
    HW = H * W
    K = 9 * C
    bb, num_bb, tile_hw, num_t = _choose_tiling(B, HW)
    B_pad = bb * num_bb

    # im2col in one XLA op: (B, C*9, H, W) -> (B, HW, C*9); pad K to 16, cast bf16.
    patches = lax.conv_general_dilated_patches(
        x_nchw.astype(jnp.float32), filter_shape=(3, 3),
        window_strides=(1, 1), padding="SAME")
    patches = jnp.transpose(patches, (0, 2, 3, 1)).reshape(B, HW, K)
    patches = jnp.pad(patches, ((0, B_pad - B), (0, 0), (0, STEM_K_PAD - K)))
    patches = patches.astype(jnp.bfloat16)
    # Padded batch rows produce finite garbage that is sliced off below; HW rows are
    # never padded (tile_hw divides HW), so real pooled sums are exact.

    cost = pl.CostEstimate(
        flops=2 * B_pad * HW * (STEM_K_PAD * STEM_N_PAD + STEM_N_PAD * FEAT_C)
              + 2 * B_pad * FEAT_C * CLASS_PAD,
        transcendentals=B_pad * CLASS_PAD,
        bytes_accessed=patches.size * 2
                       + params["w1"].size * 2 + params["w2"].size * 2
                       + params["wfc"].size * 4
                       + (params["b1"].size + params["b2"].size
                          + params["bfc"].size) * 4
                       + B_pad * CLASS_PAD * 4)

    kernel = functools.partial(_fused_mnist_kernel, 1.0 / HW, bb, tile_hw)

    out_padded = pl.pallas_call(
        kernel,
        out_shape=jax.ShapeDtypeStruct((num_bb, bb, CLASS_PAD), jnp.float32),
        grid_spec=pltpu.PrefetchScalarGridSpec(
            num_scalar_prefetch=0,
            grid=(num_bb, num_t),
            in_specs=[
                pl.BlockSpec((bb, tile_hw, STEM_K_PAD), lambda b, t: (b, t, 0)),
                # TODO(synk): single-buffer the constant-index weight/bias blocks via
                # pipeline_mode=pl.Buffered(1) once that is safe on all toolchains.
                pl.BlockSpec((STEM_K_PAD, STEM_N_PAD), lambda b, t: (0, 0)),
                pl.BlockSpec((1, STEM_N_PAD), lambda b, t: (0, 0)),
                pl.BlockSpec((STEM_N_PAD, FEAT_C), lambda b, t: (0, 0)),
                pl.BlockSpec((1, FEAT_C), lambda b, t: (0, 0)),
                pl.BlockSpec((FEAT_C, CLASS_PAD), lambda b, t: (0, 0)),
                pl.BlockSpec((1, CLASS_PAD), lambda b, t: (0, 0)),
            ],
            out_specs=pl.BlockSpec((1, bb, CLASS_PAD), lambda b, t: (b, 0, 0)),
            scratch_shapes=[pltpu.VMEM((bb, FEAT_C), jnp.float32)],
        ),
        compiler_params=pltpu.CompilerParams(
            dimension_semantics=("parallel", "arbitrary"),
            vmem_limit_bytes=48 * 1024 * 1024),
        cost_estimate=cost,
    )(patches, params["w1"], params["b1"], params["w2"], params["b2"],
      params["wfc"], params["bfc"])

    # slice the lane-dense padded output back to (B, 10)
    return out_padded.reshape(B_pad, CLASS_PAD)[:B, :NUM_CLASSES]


if __name__ == "__main__":
    key = jax.random.PRNGKey(0)
    kx, kp = jax.random.split(key)
    x = jax.random.normal(kx, (2, 1, 16, 16), jnp.float32)  # small MNIST-like NCHW input
    params = init_params(kp)

    out = mnist_model_forward(x, params)
    out = jax.block_until_ready(out)

    assert out.shape == (2, 10)
    assert jnp.allclose(jnp.sum(out, axis=-1), 1.0, atol=1e-4)  # exact softmax norm
    assert bool(jnp.all(out >= 0.0))
    assert bool(jnp.all(jnp.isfinite(out)))
    print("KERNEL_OK")
</pallas_src>

<mosaic_0001>
module attributes {stable_mosaic.version = 11 : i64} {
  func.func @_fused_mnist_kernel(%arg0: i32, %arg1: i32, %arg2: memref<1x256x16xbf16, #tpu.memory_space<vmem>>, %arg3: memref<16x128xbf16, #tpu.memory_space<vmem>>, %arg4: memref<1x128xf32, #tpu.memory_space<vmem>>, %arg5: memref<128x1024xbf16, #tpu.memory_space<vmem>>, %arg6: memref<1x1024xf32, #tpu.memory_space<vmem>>, %arg7: memref<1024x128xf32, #tpu.memory_space<vmem>>, %arg8: memref<1x128xf32, #tpu.memory_space<vmem>>, %arg9: memref<1x1x128xf32, #tpu.memory_space<vmem>>, %arg10: memref<1x1024xf32, #tpu.memory_space<vmem>>) attributes {dimension_semantics = [#tpu.dimension_semantics<parallel>, #tpu.dimension_semantics<arbitrary>], iteration_bounds = array<i64: 2, 1>, scalar_prefetch = 0 : i64, scratch_operands = 1 : i64, tpu.core_type = #tpu.core_type<tc>, window_params = [{transform_indices = @transform_0, window_bounds = array<i64: 1, 256, 16>}, {pipeline_mode = #tpu.pipeline_mode<synchronous>, transform_indices = @transform_1, window_bounds = array<i64: 16, 128>}, {pipeline_mode = #tpu.pipeline_mode<synchronous>, transform_indices = @transform_2, window_bounds = array<i64: 1, 128>}, {pipeline_mode = #tpu.pipeline_mode<synchronous>, transform_indices = @transform_3, window_bounds = array<i64: 128, 1024>}, {pipeline_mode = #tpu.pipeline_mode<synchronous>, transform_indices = @transform_4, window_bounds = array<i64: 1, 1024>}, {pipeline_mode = #tpu.pipeline_mode<synchronous>, transform_indices = @transform_5, window_bounds = array<i64: 1024, 128>}, {pipeline_mode = #tpu.pipeline_mode<synchronous>, transform_indices = @transform_6, window_bounds = array<i64: 1, 128>}, {transform_indices = @transform_7, window_bounds = array<i64: 1, 1, 128>}]} {
    %c0_i32 = arith.constant 0 : i32
    %0 = arith.cmpi eq, %arg1, %c0_i32 : i32
    %1 = arith.extui %0 : i1 to i32
    %c0_i32_0 = arith.constant 0 : i32
    %2 = arith.cmpi ne, %1, %c0_i32_0 : i32
    scf.if %2 {
      %cst_21 = arith.constant 0.000000e+00 : f32
      %28 = vector.broadcast %cst_21 : f32 to vector<1x1024xf32>
      %c0_22 = arith.constant 0 : index
      %c0_23 = arith.constant 0 : index
      %29 = vector.load %arg10[%c0_22, %c0_23] : memref<1x1024xf32, #tpu.memory_space<vmem>>, vector<1x1024xf32>
      tpu.vector_store %arg10[%c0_22, %c0_23], %28 {strides = array<i32>} : memref<1x1024xf32, #tpu.memory_space<vmem>>, vector<1x1024xf32>,
    } else {
    }
    %c0 = arith.constant 0 : index
    %c0_1 = arith.constant 0 : index
    %c0_2 = arith.constant 0 : index
    %3 = vector.load %arg2[%c0, %c0_1, %c0_2] : memref<1x256x16xbf16, #tpu.memory_space<vmem>>, vector<1x256x16xbf16>
    %4 = vector.shape_cast %3 : vector<1x256x16xbf16> to vector<256x16xbf16>
    %c0_3 = arith.constant 0 : index
    %c0_4 = arith.constant 0 : index
    %5 = vector.load %arg3[%c0_3, %c0_4] : memref<16x128xbf16, #tpu.memory_space<vmem>>, vector<16x128xbf16>
    %cst = arith.constant dense<0.000000e+00> : vector<256x128xf32>
    %6 = tpu.matmul %4, %5, %cst {dimension_numbers = #tpu.dot_dimension_numbers<[1], [0], [0], [1], [0, 0, 1, 1], [], []>} : vector<256x16xbf16>, vector<16x128xbf16>, vector<256x128xf32> -> vector<256x128xf32>
    %c0_5 = arith.constant 0 : index
    %c0_6 = arith.constant 0 : index
    %7 = vector.load %arg4[%c0_5, %c0_6] : memref<1x128xf32, #tpu.memory_space<vmem>>, vector<1x128xf32>
    %8 = vector.broadcast %7 : vector<1x128xf32> to vector<256x128xf32>
    %9 = arith.addf %6, %8 : vector<256x128xf32>
    %cst_7 = arith.constant 0.000000e+00 : f32
    %10 = vector.broadcast %cst_7 : f32 to vector<256x128xf32>
    %11 = arith.maximumf %9, %10 : vector<256x128xf32>
    %12 = arith.truncf %11 : vector<256x128xf32> to vector<256x128xbf16>
    %c0_8 = arith.constant 0 : index
    %c0_9 = arith.constant 0 : index
    %13 = vector.load %arg5[%c0_8, %c0_9] : memref<128x1024xbf16, #tpu.memory_space<vmem>>, vector<128x1024xbf16>
    %cst_10 = arith.constant dense<0.000000e+00> : vector<256x1024xf32>
    %14 = tpu.matmul %12, %13, %cst_10 {dimension_numbers = #tpu.dot_dimension_numbers<[1], [0], [0], [1], [0, 0, 1, 1], [], []>} : vector<256x128xbf16>, vector<128x1024xbf16>, vector<256x1024xf32> -> vector<256x1024xf32>
    %c0_11 = arith.constant 0 : index
    %c0_12 = arith.constant 0 : index
    %15 = vector.load %arg6[%c0_11, %c0_12] : memref<1x1024xf32, #tpu.memory_space<vmem>>, vector<1x1024xf32>
    %16 = vector.broadcast %15 : vector<1x1024xf32> to vector<256x1024xf32>
    %17 = arith.addf %14, %16 : vector<256x1024xf32>
    %cst_13 = arith.constant 0.000000e+00 : f32
    %18 = vector.broadcast %cst_13 : f32 to vector<256x1024xf32>
    %19 = arith.maximumf %17, %18 : vector<256x1024xf32>
    %c0_14 = arith.constant 0 : index
    %c0_15 = arith.constant 0 : index
    %20 = vector.load %arg10[%c0_14, %c0_15] : memref<1x1024xf32, #tpu.memory_space<vmem>>, vector<1x1024xf32>
    %21 = vector.shape_cast %19 : vector<256x1024xf32> to vector<1x256x1024xf32>
    %cst_16 = arith.constant dense<0.000000e+00> : vector<1x1024xf32>
    %22 = vector.multi_reduction <add>, %21, %cst_16 [1] : vector<1x256x1024xf32> to vector<1x1024xf32>
    %23 = arith.addf %20, %22 : vector<1x1024xf32>
    %c0_17 = arith.constant 0 : index
    %c0_18 = arith.constant 0 : index
    %24 = vector.load %arg10[%c0_17, %c0_18] : memref<1x1024xf32, #tpu.memory_space<vmem>>, vector<1x1024xf32>
    tpu.vector_store %arg10[%c0_17, %c0_18], %23 {strides = array<i32>} : memref<1x1024xf32, #tpu.memory_space<vmem>>, vector<1x1024xf32>,
    %c0_i32_19 = arith.constant 0 : i32
    %25 = arith.cmpi eq, %arg1, %c0_i32_19 : i32
    %26 = arith.extui %25 : i1 to i32
    %c0_i32_20 = arith.constant 0 : i32
    %27 = arith.cmpi ne, %26, %c0_i32_20 : i32
    scf.if %27 {
      %c0_21 = arith.constant 0 : index
      %c0_22 = arith.constant 0 : index
      %28 = vector.load %arg10[%c0_21, %c0_22] : memref<1x1024xf32, #tpu.memory_space<vmem>>, vector<1x1024xf32>
      %cst_23 = arith.constant 3.906250e-03 : f32
      %29 = vector.broadcast %cst_23 : f32 to vector<1x1024xf32>
      %30 = arith.mulf %28, %29 : vector<1x1024xf32>
      %c0_24 = arith.constant 0 : index
      %c0_25 = arith.constant 0 : index
      %31 = vector.load %arg7[%c0_24, %c0_25] : memref<1024x128xf32, #tpu.memory_space<vmem>>, vector<1024x128xf32>
      %cst_26 = arith.constant dense<0.000000e+00> : vector<1x128xf32>
      %32 = tpu.matmul %30, %31, %cst_26 {dimension_numbers = #tpu.dot_dimension_numbers<[1], [0], [0], [1], [0, 0, 1, 1], [], []>} : vector<1x1024xf32>, vector<1024x128xf32>, vector<1x128xf32> -> vector<1x128xf32>
      %c0_27 = arith.constant 0 : index
      %c0_28 = arith.constant 0 : index
      %33 = vector.load %arg8[%c0_27, %c0_28] : memref<1x128xf32, #tpu.memory_space<vmem>>, vector<1x128xf32>
      %34 = arith.addf %32, %33 : vector<1x128xf32>
      %35 = tpu.iota {dimensions = array<i32: 1>} : vector<1x128xi32>
      %c10_i32 = arith.constant 10 : i32
      %36 = vector.broadcast %c10_i32 : i32 to vector<1x128xi32>
      %37 = arith.cmpi slt, %35, %36 : vector<1x128xi32>
      %cst_29 = arith.constant -1.000000e+30 : f32
      %38 = vector.broadcast %cst_29 : f32 to vector<1x128xf32>
      %39 = arith.select %37, %34, %38 : vector<1x128xi1>, vector<1x128xf32>
      %cst_30 = arith.constant dense<0xFF800000> : vector<1xf32>
      %40 = vector.multi_reduction <maximumf>, %39, %cst_30 [1] : vector<1x128xf32> to vector<1xf32>
      %41 = vector.shape_cast %40 : vector<1xf32> to vector<1x1xf32>
      %42 = vector.broadcast %41 : vector<1x1xf32> to vector<1x128xf32>
      %43 = arith.subf %39, %42 : vector<1x128xf32>
      %44 = math.exp %43 : vector<1x128xf32>
      %cst_31 = arith.constant dense<0.000000e+00> : vector<1xf32>
      %45 = vector.multi_reduction <add>, %44, %cst_31 [1] : vector<1x128xf32> to vector<1xf32>
      %46 = vector.shape_cast %45 : vector<1xf32> to vector<1x1xf32>
      %47 = vector.broadcast %46 : vector<1x1xf32> to vector<1x128xf32>
      %48 = arith.divf %44, %47 : vector<1x128xf32>
      %c0_32 = arith.constant 0 : index
      %c0_33 = arith.constant 0 : index
      %c0_34 = arith.constant 0 : index
      %49 = vector.load %arg9[%c0_32, %c0_33, %c0_34] : memref<1x1x128xf32, #tpu.memory_space<vmem>>, vector<1x1x128xf32>
      %50 = vector.shape_cast %49 : vector<1x1x128xf32> to vector<1x128xf32>
      %51 = vector.shape_cast %48 : vector<1x128xf32> to vector<1x1x128xf32>
      tpu.vector_store %arg9[%c0_32, %c0_33, %c0_34], %51 {strides = array<i32>} : memref<1x1x128xf32, #tpu.memory_space<vmem>>, vector<1x1x128xf32>,
    } else {
    }
    return
  }
  func.func @transform_0(%arg0: i32, %arg1: i32) -> (i32, i32, i32) {
    %c0_i32 = arith.constant 0 : i32
    %c0_i32_0 = arith.constant 0 : i32
    return %arg0, %arg1, %c0_i32 : i32, i32, i32
  }
  func.func @transform_1(%arg0: i32, %arg1: i32) -> (i32, i32) {
    %c0_i32 = arith.constant 0 : i32
    %c0_i32_0 = arith.constant 0 : i32
    %c0_i32_1 = arith.constant 0 : i32
    return %c0_i32, %c0_i32_0 : i32, i32
  }
  func.func @transform_2(%arg0: i32, %arg1: i32) -> (i32, i32) {
    %c0_i32 = arith.constant 0 : i32
    %c0_i32_0 = arith.constant 0 : i32
    %c0_i32_1 = arith.constant 0 : i32
    return %c0_i32, %c0_i32_0 : i32, i32
  }
  func.func @transform_3(%arg0: i32, %arg1: i32) -> (i32, i32) {
    %c0_i32 = arith.constant 0 : i32
    %c0_i32_0 = arith.constant 0 : i32
    %c0_i32_1 = arith.constant 0 : i32
    return %c0_i32, %c0_i32_0 : i32, i32
  }
  func.func @transform_4(%arg0: i32, %arg1: i32) -> (i32, i32) {
    %c0_i32 = arith.constant 0 : i32
    %c0_i32_0 = arith.constant 0 : i32
    %c0_i32_1 = arith.constant 0 : i32
    return %c0_i32, %c0_i32_0 : i32, i32
  }
  func.func @transform_5(%arg0: i32, %arg1: i32) -> (i32, i32) {
    %c0_i32 = arith.constant 0 : i32
    %c0_i32_0 = arith.constant 0 : i32
    %c0_i32_1 = arith.constant 0 : i32
    return %c0_i32, %c0_i32_0 : i32, i32
  }
  func.func @transform_6(%arg0: i32, %arg1: i32) -> (i32, i32) {
    %c0_i32 = arith.constant 0 : i32
    %c0_i32_0 = arith.constant 0 : i32
    %c0_i32_1 = arith.constant 0 : i32
    return %c0_i32, %c0_i32_0 : i32, i32
  }
  func.func @transform_7(%arg0: i32, %arg1: i32) -> (i32, i32, i32) {
    %c0_i32 = arith.constant 0 : i32
    %c0_i32_0 = arith.constant 0 : i32
    %c0_i32_1 = arith.constant 0 : i32
    return %arg0, %c0_i32, %c0_i32_0 : i32, i32, i32
  }
}

</mosaic_0001>

<bundles_post_ra>
// kernel: mnist_model_forward.1
= control target key start
LH: loop header
LB: loop body
LE: loop exit
PB: predicated region body
PF: predicated region fallthrough
CT: control target
= control target key end

     0   :  { %12 = vsyncpa [#allocation4], 0  ;;  %s5053_s0 = inlined_call_operand.vmem [shape: bf16[2,256,16], index: 0, kind: input, shape index: {}]   ;;  %s5054_s1 = inlined_call_operand.vmem [shape: bf16[16,128], index: 1, kind: input, shape index: {}]   ;;  %s5055_s2 = inlined_call_operand.vmem [shape: f32[1,128], index: 2, kind: input, shape index: {}]   ;;  %s5056_s3 = inlined_call_operand.vmem [shape: bf16[128,1024], index: 3, kind: input, shape index: {}]   ;;  %s5057_s4 = inlined_call_operand.vmem [shape: f32[1,1024], index: 4, kind: input, shape index: {}]   ;;  %s5058_s5 = inlined_call_operand.vmem [shape: f32[1024,128], index: 5, kind: input, shape index: {}]   ;;  %s5059_s6 = inlined_call_operand.vmem [shape: f32[1,128], index: 6, kind: input, shape index: {}]   ;;  %s5060_s7 = inlined_call_operand.hbm [shape: f32[2,1,128], index: 7, kind: output, shape index: {}]  }
   0x1   :  { %14 = vsyncpa [#allocation4 + $0x1], 0  ;;  %s3560_s24 = smov 0   ;;  %s3562_s25 = smov 0  }
   0x2   :  { %s3564_s26 = smov 0   ;;  %s3566_s27 = smov 0  }
   0x3   :  { %s3568_s28 = smov 0   ;;  %s3570_s29 = smov 0  }
   0x4 LB: > { %s3060_s30 = sadd.s32 4294967295, %s3515_s29   ;;  %s3061_s8 = sadd.s32 4294967294, %s3515_s29   ;;  %s3515_s29 = sphi %s3570_s29, %s20_s29   ;;  %s3511_s28 = sphi %s3568_s28, %s5086_s28   ;;  %s3507_s27 = sphi %s3566_s27, %s5085_s27   ;;  %s3503_s26 = sphi %s3564_s26, %s5084_s26   ;;  %s3499_s25 = sphi %s3562_s25, %s5083_s25   ;;  %s3495_s24 = sphi %s3560_s24, %s5082_s24  }
   0x5   : > { %s32_s9 = sadd.s32 1, %s3511_s28  ;;  %s193_s10 = sadd.s32 1, %s3503_s26 }
   0x6   : > { %p34_p0 = scmp.ge.s32.totalorder %s32_s9, 2  ;;  %p203_p1 = scmp.ne.s32.totalorder %s3503_s26, %s3499_s25 }
   0x7   : > { %p204_p2 = scmp.eq.s32.totalorder %s3060_s30, 1  ;;  %p209_p3 = scmp.ne.s32.totalorder %s3499_s25, %s3495_s24 }
   0x8   : > { %s5088_s9 = smov (%p34_p0, %s32_s9), 0  ;;  %p210_p5 = scmp.eq.s32.totalorder %s3061_s8, 1 }
   0x9   : > { %p3600_p4 = por %p204_p2, %p203_p1  ;;  %s190_s12 = ssub.s32 %s3511_s28, %s5088_s9 }
   0xa   : > { %p3064_p6 = scmp.ge.s32.totalorder %s3515_s29, 1  ;;  %p191_p7 = scmp.eq.s32.totalorder %s190_s12, 0 }
   0xb   : > { %p3607_p8 = por %p210_p5, %p209_p3  ;;  %p259_p9 = scmp.lt.s32.totalorder %s3515_s29, 3 }
   0xc   : > { %s3613_s14 = scalar_select %p191_p7, %s3503_s26, %s193_s10  }
   0xd   : > { %p260_p10 = pnand %p3064_p6, %p259_p9 }
   0xe   : > { %p295_p11 = scmp.lt.s32.totalorder (!%p260_p10), %s3507_s27, 1  ;;  %s3519_s23 = smov (!%p260_p10), [#allocation3]  }
   0xf   : > { %263 = sbr.rel (%p260_p10) target bundleno = 1301 (0x515), region = 48  ;;  %s3443_s8 = sshll.u32 (!%p260_p10), %s3519_s23, 4  ;;  %s3444_s8 = int_to_ptr.vmem [resolvable:$false] %s3443_s8 }
  0x14   : > { %v3417_v0 = vld [vmem:[%s5054_s1] sm:$0xff]   ;;  %v752_v1 = vld [vmem:[%s5056_s3 + $0x1c8] sm:$0xff]  ;;  %s296_s21 = scalar_select %p295_p11, %s3507_s27, 1  ;;  %vm437_vm0 = vcmask 130048   ;;  %vm2965_vm2 = vcmask 1040384  }
  0x15   : > { %v756_v2 = vld [vmem:[%s5056_s3 + $0x1e8] sm:$0xff]  ;;  %3326 = vmatprep.subr.bf16.mxu0 %v3417_v0  ;;  %v751_v4 = vld [vmem:[%s5056_s3 + $0x1c0] sm:$0xff] }
  0x16   : > { %v3160_v3 = vcombine.high %v752_v1, %v756_v2  ;;  %3327 = vmatpush3.bf16.msra.mxu0 %v3417_v0  ;;  %s3168_s30 = sshll.u32 %s296_s21, 7  ;;  %v744_v5 = vld [vmem:[%s5056_s3 + $0x188] sm:$0xff]  ;;  %v755_v7 = vld [vmem:[%s5056_s3 + $0x1e0] sm:$0xff]  ;;  %v3159_v13 = vcombine.low %v752_v1, %v756_v2 }
  0x17   : > { %v748_v6 = vld [vmem:[%s5056_s3 + $0x1a8] sm:$0xff]  ;;  %s3641_s20 = scalar_lea.vmem %s5053_s0, %s3168_s30  ;;  %v3158_v8 = vcombine.high %v751_v4, %v755_v7  ;;  %v3157_v9 = vcombine.low %v751_v4, %v755_v7  ;;  %v743_v10 = vld [vmem:[%s5056_s3 + $0x180] sm:$0xff]  ;;  %s292_s30 = sand.u32 1, %s3499_s25  }
  0x18   : > { %1314 = vmatprep.subr.bf16.mxu0 %v3160_v3  ;;  %v747_v11 = vld [vmem:[%s5056_s3 + $0x1a0] sm:$0xff]  ;;  %v736_v14 = vld [vmem:[%s5056_s3 + $0x148] sm:$0xff]  ;;  %v3152_v18 = vcombine.high %v744_v5, %v748_v6  ;;  %v3420_v19 = vld [vmem:[%s3641_s20 + $0x10] sm:$0xff]   ;;  %v3151_v21 = vcombine.low %v744_v5, %v748_v6  ;;  %s293_s15 = scalar_lea.vmem [#allocation3], %s292_s30  ;;  %s2979_s21 = scalar_lea.sflag [#allocation4], %s292_s30 }
  0x19   : > { %v3418_v12 = vld [vmem:[%s3641_s20] sm:$0xff]   ;;  %v740_v15 = vld [vmem:[%s5056_s3 + $0x168] sm:$0xff]  ;;  %v3150_v16 = vcombine.high %v743_v10, %v747_v11  ;;  %1121 = vmatprep.subr.bf16.mxu1 %v3158_v8  ;;  %v3149_v20 = vcombine.low %v743_v10, %v747_v11  ;;  %v3421_v25 = vld [vmem:[%s3641_s20 + $0x18] sm:$0xff]   ;;  %s2991_s16 = sshll.u32 %s293_s15, 4  ;;  %s2992_s16 = int_to_ptr.vmem [resolvable:$true] %s2991_s16 }
  0x1a   : > { %v3419_v17 = vld [vmem:[%s3641_s20 + $0x8] sm:$0xff]   ;;  %3328 = vmatprep.mubr.msk.bf16.mxu0 %vm437_vm0, %v3418_v12  ;;  %1122 = vmatpush1.bf16.msra.mxu1 %v3157_v9  ;;  %v3144_v22 = vcombine.high %v736_v14, %v740_v15  ;;  %v3422_v26 = vld [vmem:[%s3641_s20 + $0x20] sm:$0xff]   ;;  %v3143_v27 = vcombine.low %v736_v14, %v740_v15  ;;  %v3424_v35 = vld [vmem:[%s3641_s20 + $0x30] sm:$0xff]   ;;  %s3439_s22 = scalar_lea.vmem %s2992_s16, 16  ;;  %p3446_p1 = scmp.lt.s32.totalorder %s2992_s16, %s3444_s8 }
  0x1b   : > { %3329 = vmatmul.mubr.msk.bf16.vlgmr.msra.gmra.mxu0 %vm437_vm0, %v3419_v17  ;;  %1123 = vmatprep.subr.bf16.mxu1 %v3150_v16  ;;  %v728_v23 = vld [vmem:[%s5056_s3 + $0x108] sm:$0xff]  ;;  %v735_v33 = vld [vmem:[%s5056_s3 + $0x140] sm:$0xff]  ;;  %v3425_v54 = vld [vmem:[%s3641_s20 + $0x38] sm:$0xff]   ;;  %v3517_v17 = vmov 0   ;;  %p3440_p12 = scmp.ne.s32.totalorder %s2992_s16, %s3439_s22 }
  0x1c   : > { %3332 = vmatprep.mubr.msk.bf16.mxu0 %vm437_vm0, %v3420_v19  ;;  %1315 = vmatpush1.bf16.msra.mxu0 %v3159_v13  ;;  %v732_v24 = vld [vmem:[%s5056_s3 + $0x128] sm:$0xff]  ;;  %v739_v37 = vld [vmem:[%s5056_s3 + $0x160] sm:$0xff]  ;;  %v3428_v59 = vld [vmem:[%s3641_s20 + $0x50] sm:$0xff]  }
  0x1d   : > { %1316 = vmatprep.subr.bf16.mxu0 %v3152_v18  ;;  %v3136_v28 = vcombine.high %v728_v23, %v732_v24  ;;  %v720_v29 = vld [vmem:[%s5056_s3 + $0xc8] sm:$0xff]  ;;  %v3135_v31 = vcombine.low %v728_v23, %v732_v24  ;;  %v3142_v40 = vcombine.high %v735_v33, %v739_v37  ;;  %v3141_v42 = vcombine.low %v735_v33, %v739_v37  ;;  %v727_v43 = vld [vmem:[%s5056_s3 + $0x100] sm:$0xff]  ;;  %v3429_v60 = vld [vmem:[%s3641_s20 + $0x58] sm:$0xff]   ;;  %p3441_p13 = pnand %p3440_p12, %p3600_p4 }
  0x1e   : > { %1124 = vmatpush1.bf16.msra.mxu1 %v3149_v20  ;;  %v724_v30 = vld [vmem:[%s5056_s3 + $0xe8] sm:$0xff]  ;;  %v731_v44 = vld [vmem:[%s5056_s3 + $0x120] sm:$0xff]  ;;  %v3432_v63 = vld [vmem:[%s3641_s20 + $0x70] sm:$0xff]   ;;  %1153 = vmatprep.mubr.bf16.mxu1 %v3517_v17 }
  0x1f   : > { %v3128_v32 = vcombine.high %v720_v29, %v724_v30  ;;  %v3423_v34 = vld [vmem:[%s3641_s20 + $0x28] sm:$0xff]   ;;  %v3127_v36 = vcombine.low %v720_v29, %v724_v30  ;;  %v3134_v45 = vcombine.high %v727_v43, %v731_v44  ;;  %1125 = vmatprep.subr.bf16.mxu1 %v3142_v40  ;;  %v719_v48 = vld [vmem:[%s5056_s3 + $0xc0] sm:$0xff]  ;;  %v3133_v51 = vcombine.low %v727_v43, %v731_v44  ;;  %v3433_v0 = vld [vmem:[%s3641_s20 + $0x78] sm:$0xff]   ;;  %p3442_p0 = pneg %p3441_p13 }
  0x20   : > { %1317 = vmatpush1.bf16.msra.mxu0 %v3151_v21  ;;  %v712_v38 = vld [vmem:[%s5056_s3 + $0x88] sm:$0xff]  ;;  %v723_v49 = vld [vmem:[%s5056_s3 + $0xe0] sm:$0xff]  ;;  %v753_v18 = vld [vmem:[%s5056_s3 + $0x1d0] sm:$0xff] }
  0x21   : > { %1318 = vmatprep.subr.bf16.mxu0 %v3144_v22  ;;  %v716_v39 = vld [vmem:[%s5056_s3 + $0xa8] sm:$0xff]  ;;  %v3126_v53 = vcombine.high %v719_v48, %v723_v49  ;;  %v3426_v55 = vld [vmem:[%s3641_s20 + $0x40] sm:$0xff]   ;;  %v3125_v57 = vcombine.low %v719_v48, %v723_v49  ;;  %v757_v19 = vld [vmem:[%s5056_s3 + $0x1f0] sm:$0xff] }
  0x22   : > { %v3120_v41 = vcombine.high %v712_v38, %v716_v39  ;;  %v704_v46 = vld [vmem:[%s5056_s3 + $0x48] sm:$0xff]  ;;  %v3119_v50 = vcombine.low %v712_v38, %v716_v39  ;;  %1126 = vmatpush1.bf16.msra.mxu1 %v3141_v42  ;;  %v3430_v61 = vld [vmem:[%s3641_s20 + $0x60] sm:$0xff]   ;;  %v754_v20 = vld [vmem:[%s5056_s3 + $0x1d8] sm:$0xff]  ;;  %v3161_v21 = vcombine.low %v753_v18, %v757_v19  ;;  %v3162_v22 = vcombine.high %v753_v18, %v757_v19 }
  0x23   : > { %3333 = vmatmul.mubr.msk.bf16.gmra.mxu0 %vm437_vm0, %v3421_v25  ;;  %v708_v47 = vld [vmem:[%s5056_s3 + $0x68] sm:$0xff]  ;;  %1127 = vmatprep.subr.bf16.mxu1 %v3134_v45  ;;  %v711_v1 = vld [vmem:[%s5056_s3 + $0x80] sm:$0xff]  ;;  %v758_v23 = vld [vmem:[%s5056_s3 + $0x1f8] sm:$0xff] }
  0x24   : > { %3336 = vmatprep.mubr.msk.bf16.mxu0 %vm437_vm0, %v3422_v26  ;;  %1319 = vmatpush1.bf16.msra.mxu0 %v3143_v27  ;;  %v3112_v52 = vcombine.high %v704_v46, %v708_v47  ;;  %v3111_v56 = vcombine.low %v704_v46, %v708_v47  ;;  %v3427_v58 = vld [vmem:[%s3641_s20 + $0x48] sm:$0xff]   ;;  %v715_v2 = vld [vmem:[%s5056_s3 + $0xa0] sm:$0xff]  ;;  %v3163_v24 = vcombine.low %v754_v20, %v758_v23  ;;  %v749_v37 = vld [vmem:[%s5056_s3 + $0x1b0] sm:$0xff] }
  0x25   : > { %1320 = vmatprep.subr.bf16.mxu0 %v3136_v28  ;;  %v3431_v62 = vld [vmem:[%s3641_s20 + $0x68] sm:$0xff]   ;;  %v3118_v3 = vcombine.high %v711_v1, %v715_v2  ;;  %v3117_v4 = vcombine.low %v711_v1, %v715_v2  ;;  %v703_v5 = vld [vmem:[%s5056_s3 + $0x40] sm:$0xff]  ;;  %v3164_v25 = vcombine.high %v754_v20, %v758_v23  ;;  %v746_v38 = vld [vmem:[%s5056_s3 + $0x198] sm:$0xff]  ;;  %s3165_s20 = sshll.u32 %s3507_s27, 4  ;;  %s3445_s27 = scalar_lea.vmem %s3444_s8, 32 }
  0x26   : > { %1128 = vmatpush1.bf16.msra.mxu1 %v3133_v51  ;;  %v707_v6 = vld [vmem:[%s5056_s3 + $0x60] sm:$0xff]  ;;  %v696_v9 = vld [vmem:[%s5056_s3 + $0x8] sm:$0xff]  ;;  %v750_v39 = vld [vmem:[%s5056_s3 + $0x1b8] sm:$0xff]  ;;  %s2989_s19 = scalar_lea.hbm %s5060_s7, %s3165_s20  ;;  %p3447_p2 = scmp.lt.s32.totalorder %s3445_s27, %s3439_s22 }
  0x27   : > { %1129 = vmatprep.subr.bf16.mxu1 %v3126_v53  ;;  %v3110_v7 = vcombine.high %v703_v5, %v707_v6  ;;  %v3109_v8 = vcombine.low %v703_v5, %v707_v6  ;;  %v700_v10 = vld [vmem:[%s5056_s3 + $0x28] sm:$0xff]  ;;  %v695_v11 = vld [vmem:[%s5056_s3] sm:$0xff]  ;;  %v737_v43 = vld [vmem:[%s5056_s3 + $0x150] sm:$0xff]  ;;  %v3156_v46 = vcombine.high %v746_v38, %v750_v39 }
  0x28   : > { %1321 = vmatpush1.bf16.msra.mxu0 %v3135_v31  ;;  %v3104_v12 = vcombine.high %v696_v9, %v700_v10  ;;  %v699_v13 = vld [vmem:[%s5056_s3 + $0x20] sm:$0xff]  ;;  %v3103_v14 = vcombine.low %v696_v9, %v700_v10  ;;  %v741_v47 = vld [vmem:[%s5056_s3 + $0x170] sm:$0xff]  ;;  %v738_v48 = vld [vmem:[%s5056_s3 + $0x158] sm:$0xff]  ;;  %p3448_p3 = por %p3447_p2, %p3446_p1 }
  0x29   : > { %1322 = vmatprep.subr.bf16.mxu0 %v3128_v32  ;;  %v3102_v15 = vcombine.high %v695_v11, %v699_v13  ;;  %v3101_v16 = vcombine.low %v695_v11, %v699_v13  ;;  %v3770_v28 = vld [vmem:[%s5055_s2] ss:$0 sm:$0xff]  ;;  %v742_v49 = vld [vmem:[%s5056_s3 + $0x178] sm:$0xff]  ;;  %v721_v6 = vld [vmem:[%s5056_s3 + $0xd0] sm:$0xff] }
  0x2a   : > { %1130 = vmatpush1.bf16.msra.mxu1 %v3125_v57  ;;  %v729_v57 = vld [vmem:[%s5056_s3 + $0x110] sm:$0xff]  ;;  %v726_v9 = vld [vmem:[%s5056_s3 + $0xf8] sm:$0xff]  ;;  %p3449_p5 = pnand %p3448_p3, %p3442_p0 }
  0x2b   : > { %3337 = vmatmul.mubr.msk.bf16.gmra.mxu0 %vm437_vm0, %v3423_v34  ;;  %1131 = vmatprep.subr.bf16.mxu1 %v3118_v3  ;;  %v745_v34 = vld [vmem:[%s5056_s3 + $0x190] sm:$0xff]  ;;  %v714_v20 = vld [vmem:[%s5056_s3 + $0x98] sm:$0xff] }
  0x2c   : > { %3340 = vmatprep.mubr.msk.bf16.mxu0 %vm437_vm0, %v3424_v35  ;;  %1323 = vmatpush1.bf16.msra.mxu0 %v3127_v36  ;;  %v3154_v45 = vcombine.high %v745_v34, %v749_v37  ;;  %v3153_v51 = vcombine.low %v745_v34, %v749_v37  ;;  %v713_v18 = vld [vmem:[%s5056_s3 + $0x90] sm:$0xff]  ;;  %v710_v34 = vld [vmem:[%s5056_s3 + $0x78] sm:$0xff] }
  0x2d   : > { %1324 = vmatprep.subr.bf16.mxu0 %v3120_v41  ;;  %v717_v19 = vld [vmem:[%s5056_s3 + $0xb0] sm:$0xff] }
  0x2e   : > { %1132 = vmatpush1.bf16.msra.mxu1 %v3117_v4  ;;  %v3121_v37 = vcombine.low %v713_v18, %v717_v19 }
  0x2f   : > { %1133 = vmatprep.subr.bf16.mxu1 %v3110_v7  ;;  %v725_v7 = vld [vmem:[%s5056_s3 + $0xf0] sm:$0xff] }
  0x30   : > { %1325 = vmatpush1.bf16.msra.mxu0 %v3119_v50 }
  0x31   : > { %1326 = vmatprep.subr.bf16.mxu0 %v3112_v52  ;;  %v3155_v52 = vcombine.low %v746_v38, %v750_v39 }
  0x32   : > { %1134 = vmatpush1.bf16.msra.mxu1 %v3109_v8  ;;  %v722_v8 = vld [vmem:[%s5056_s3 + $0xd8] sm:$0xff] }
  0x33   : > { %3341 = vmatmul.mubr.msk.bf16.gmra.mxu0 %vm437_vm0, %v3425_v54  ;;  %1135 = vmatprep.subr.bf16.mxu1 %v3102_v15  ;;  %v3146_v54 = vcombine.high %v737_v43, %v741_v47  ;;  %v3130_v15 = vcombine.high %v721_v6, %v725_v7  ;;  %v3131_v23 = vcombine.low %v722_v8, %v726_v9 }
  0x34   : > { %3344 = vmatprep.mubr.msk.bf16.mxu0 %vm437_vm0, %v3426_v55  ;;  %1327 = vmatpush1.bf16.msra.mxu0 %v3111_v56  ;;  %v3148_v55 = vcombine.high %v738_v48, %v742_v49 }
  0x35   : > { %1328 = vmatprep.subr.bf16.mxu0 %v3104_v12 }
  0x36   : > { %1136 = vmatpush1.bf16.msra.mxu1 %v3101_v16  ;;  %v3132_v16 = vcombine.high %v722_v8, %v726_v9 }
  0x37   : > { %1507 = vmatprep.subr.bf16.mxu1 %v3162_v22  ;;  %v3129_v22 = vcombine.low %v721_v6, %v725_v7 }
  0x38   : > { %1329 = vmatpush1.bf16.msra.mxu0 %v3103_v14 }
  0x39   : > { %1700 = vmatprep.subr.bf16.mxu0 %v3164_v25 }
  0x3b   : > { %3345 = vmatmul.mubr.msk.bf16.gmra.mxu0 %vm437_vm0, %v3427_v58 }
  0x3c   : > { %3348 = vmatprep.mubr.msk.bf16.mxu0 %vm437_vm0, %v3428_v59  ;;  %v733_v59 = vld [vmem:[%s5056_s3 + $0x130] sm:$0xff] }
  0x3d   : > { %v3138_v4 = vcombine.high %v729_v57, %v733_v59  ;;  %v3137_v12 = vcombine.low %v729_v57, %v733_v59 }
  0x43   : > { %3349 = vmatmul.mubr.msk.bf16.gmra.mxu0 %vm437_vm0, %v3429_v60  ;;  %v730_v60 = vld [vmem:[%s5056_s3 + $0x118] sm:$0xff] }
  0x44   : > { %3352 = vmatprep.mubr.msk.bf16.mxu0 %vm437_vm0, %v3430_v61  ;;  %v734_v61 = vld [vmem:[%s5056_s3 + $0x138] sm:$0xff] }
  0x45   : > { %v3140_v5 = vcombine.high %v730_v60, %v734_v61  ;;  %v3139_v13 = vcombine.low %v730_v60, %v734_v61 }
  0x4b   : > { %3353 = vmatmul.mubr.msk.bf16.gmra.mxu0 %vm437_vm0, %v3431_v62  ;;  %v3145_v62 = vcombine.low %v737_v43, %v741_v47  ;;  %v697_v43 = vld [vmem:[%s5056_s3 + $0x10] sm:$0xff] }
  0x4c   : > { %3356 = vmatprep.mubr.msk.bf16.mxu0 %vm437_vm0, %v3432_v63  ;;  %v3147_v63 = vcombine.low %v738_v48, %v742_v49 }
  0x53   : > { %3357 = vmatmul.mubr.msk.bf16.gmra.mxu0 %vm437_vm0, %v3433_v0 }
  0x54   : > { %1346 = vmatprep.mubr.bf16.mxu0 %v3517_v17 }
  0xdb   : > { %v3330_v26 = vpop.f32.mrf.mxu0 }
  0xdc   : > { %v529_v50 = vadd.f32 %v3330_v26, %v3770_v28 }
  0xdd   : > { %v520_v27 = vpop.f32.mrf.mxu0 }
  0xde   : > { %v521_v30 = vadd.f32 %v3770_v28, %v520_v27  ;;  %v649_v58 = vmax.f32 %v529_v50, 0.0 }
  0xdf   : > { %v3331_v29 = vpop.f32.mrf.mxu0 }
  0xe0   : > { %v647_v35 = vmax.f32 %v521_v30, 0.0  ;;  %v532_v41 = vadd.f32 %v3331_v29, %v3770_v28  ;;  %v3122_v29 = vcombine.high %v713_v18, %v717_v19 }
  0xe1   : > { %v523_v31 = vpop.f32.mrf.mxu0 }
  0xe2   : > { %v524_v32 = vadd.f32 %v3770_v28, %v523_v31  ;;  %v650_v53 = vmax.f32 %v532_v41, 0.0  ;;  %v705_v31 = vld [vmem:[%s5056_s3 + $0x50] sm:$0xff] }
  0xe3   : > { %v3774_v33 = vpop.f32.mrf.mxu0 }
  0xe4   : > { %v648_v36 = vmax.f32 %v524_v32, 0.0  ;;  %v3822_v0 = vpack.c.bf16 %v650_v53, %v649_v58  ;;  %v709_v32 = vld [vmem:[%s5056_s3 + $0x70] sm:$0xff] }
  0xe5   : > { %v536_v40 = vpop.f32.mrf.mxu0  ;;  %v3113_v47 = vcombine.low %v705_v31, %v709_v32 }
  0xe6   : > { %v3789_v42 = vpack.c.bf16 %v648_v36, %v647_v35  ;;  %v537_v1 = vadd.f32 %v3770_v28, %v536_v40  ;;  %v3114_v40 = vcombine.high %v705_v31, %v709_v32 }
  0xe7   : > { %v3794_v44 = vpop.f32.mrf.mxu0 }
  0xe8   : > { %1154 = vmatmul.mubr.bf16.vlgmr.msra.gmra.mxu1 %v3789_v42  ;;  %1347 = vmatmul.mubr.bf16.vlgmr.msra.gmra.mxu0 %v3789_v42  ;;  %v651_v10 = vmax.f32 %v537_v1, 0.0  ;;  %v548_v25 = vadd.f32 %v3794_v44, %v3770_v28  ;;  %v701_v44 = vld [vmem:[%s5056_s3 + $0x30] sm:$0xff] }
  0xe9   : > { %1508 = vmatpush1.bf16.msra.mxu1 %v3161_v21  ;;  %1701 = vmatpush1.bf16.msra.mxu0 %v3163_v24  ;;  %v539_v56 = vpop.f32.mrf.mxu0  ;;  %v718_v21 = vld [vmem:[%s5056_s3 + $0xb8] sm:$0xff]  ;;  %v545_v24 = vadd.f32 %v3774_v33, %v3770_v28  ;;  %v3106_v53 = vcombine.high %v697_v43, %v701_v44  ;;  %v3105_v57 = vcombine.low %v697_v43, %v701_v44 }
  0xea   : > { %1163 = vmatprep.mubr.bf16.mxu1 %v3517_v17  ;;  %1356 = vmatprep.mubr.bf16.mxu0 %v3517_v17  ;;  %v540_v2 = vadd.f32 %v3770_v28, %v539_v56  ;;  %v3124_v30 = vcombine.high %v714_v20, %v718_v21  ;;  %v706_v33 = vld [vmem:[%s5056_s3 + $0x58] sm:$0xff]  ;;  %v654_v36 = vmax.f32 %v548_v25, 0.0  ;;  %v3123_v38 = vcombine.low %v714_v20, %v718_v21 }
  0xeb   : > { %1509 = vmatprep.subr.bf16.mxu1 %v3154_v45  ;;  %1702 = vmatprep.subr.bf16.mxu0 %v3156_v46  ;;  %v3826_v3 = vpop.f32.mrf.mxu0  ;;  %v653_v35 = vmax.f32 %v545_v24, 0.0  ;;  %v3116_v41 = vcombine.high %v706_v33, %v710_v34  ;;  %v698_v45 = vld [vmem:[%s5056_s3 + $0x18] sm:$0xff]  ;;  %v3115_v48 = vcombine.low %v706_v33, %v710_v34 }
  0xec   : > { %v652_v11 = vmax.f32 %v540_v2, 0.0  ;;  %v702_v46 = vld [vmem:[%s5056_s3 + $0x38] sm:$0xff]  ;;  %v561_v60 = vadd.f32 %v3826_v3, %v3770_v28 }
  0xed   : > { %1510 = vmatpush1.bf16.msra.mxu1 %v3153_v51  ;;  %1703 = vmatpush1.bf16.msra.mxu0 %v3155_v52  ;;  %v552_v14 = vpop.f32.mrf.mxu0  ;;  %v3890_v49 = vpack.c.bf16 %v654_v36, %v653_v35  ;;  %v3107_v58 = vcombine.low %v698_v45, %v702_v46 }
  0xee   : > { %1511 = vmatprep.subr.bf16.mxu1 %v3146_v54  ;;  %1704 = vmatprep.subr.bf16.mxu0 %v3148_v55  ;;  %v3860_v26 = vpack.c.bf16 %v652_v11, %v651_v10  ;;  %v553_v50 = vadd.f32 %v3770_v28, %v552_v14  ;;  %v3108_v54 = vcombine.high %v698_v45, %v702_v46  ;;  %v657_v1 = vmax.f32 %v561_v60, 0.0 }
  0xef   : > { %v3339_v27 = vpop.f32.mrf.mxu0 }
  0xf0   : > { %1164 = vmatmul.mubr.bf16.gmra.mxu1 %v3822_v0  ;;  %1357 = vmatmul.mubr.bf16.gmra.mxu0 %v3822_v0  ;;  %v655_v55 = vmax.f32 %v553_v50, 0.0  ;;  %v564_v61 = vadd.f32 %v3339_v27, %v3770_v28 }
  0xf1   : > { %1173 = vmatprep.mubr.bf16.mxu1 %v3517_v17  ;;  %1366 = vmatprep.mubr.bf16.mxu0 %v3517_v17  ;;  %v555_v39 = vpop.f32.mrf.mxu0 }
  0xf2   : > { %1512 = vmatpush1.bf16.msra.mxu1 %v3145_v62  ;;  %1705 = vmatpush1.bf16.msra.mxu0 %v3147_v63  ;;  %v556_v51 = vadd.f32 %v3770_v28, %v555_v39  ;;  %v658_v2 = vmax.f32 %v564_v61, 0.0 }
  0xf3   : > { %1513 = vmatprep.subr.bf16.mxu1 %v3138_v4  ;;  %1706 = vmatprep.subr.bf16.mxu0 %v3140_v5  ;;  %v3342_v52 = vpop.f32.mrf.mxu0 }
  0xf4   : > { %v656_v56 = vmax.f32 %v556_v51, 0.0  ;;  %v3907_v5 = vpack.c.bf16 %v658_v2, %v657_v1  ;;  %v577_v11 = vadd.f32 %v3342_v52, %v3770_v28 }
  0xf5   : > { %v568_v59 = vpop.f32.mrf.mxu0 }
  0xf6   : > { %1514 = vmatpush1.bf16.msra.mxu1 %v3137_v12  ;;  %1707 = vmatpush1.bf16.msra.mxu0 %v3139_v13  ;;  %v3901_v62 = vpack.c.bf16 %v656_v56, %v655_v55  ;;  %v569_v3 = vadd.f32 %v3770_v28, %v568_v59 }
  0xf7   : > { %1515 = vmatprep.subr.bf16.mxu1 %v3130_v15  ;;  %1708 = vmatprep.subr.bf16.mxu0 %v3132_v16  ;;  %v3343_v63 = vpop.f32.mrf.mxu0  ;;  %v661_v15 = vmax.f32 %v577_v11, 0.0 }
  0xf8   : > { %1174 = vmatmul.mubr.bf16.gmra.mxu1 %v3860_v26  ;;  %1367 = vmatmul.mubr.bf16.gmra.mxu0 %v3860_v26  ;;  %v659_v8 = vmax.f32 %v569_v3, 0.0  ;;  %v580_v12 = vadd.f32 %v3343_v63, %v3770_v28 }
  0xf9   : > { %1183 = vmatprep.mubr.bf16.mxu1 %v3517_v17  ;;  %1376 = vmatprep.mubr.bf16.mxu0 %v3517_v17  ;;  %v571_v4 = vpop.f32.mrf.mxu0 }
  0xfa   : > { %1516 = vmatpush1.bf16.msra.mxu1 %v3129_v22  ;;  %1709 = vmatpush1.bf16.msra.mxu0 %v3131_v23  ;;  %v572_v6 = vadd.f32 %v3770_v28, %v571_v4  ;;  %v662_v16 = vmax.f32 %v580_v12, 0.0 }
  0xfb   : > { %1517 = vmatprep.subr.bf16.mxu1 %v3122_v29  ;;  %1710 = vmatprep.subr.bf16.mxu0 %v3124_v30  ;;  %v3346_v7 = vpop.f32.mrf.mxu0 }
  0xfc   : > { %v660_v9 = vmax.f32 %v572_v6, 0.0  ;;  %v3923_v19 = vpack.c.bf16 %v662_v16, %v661_v15  ;;  %v593_v27 = vadd.f32 %v3346_v7, %v3770_v28 }
  0xfd   : > { %v584_v10 = vpop.f32.mrf.mxu0 }
  0xfe   : > { %1518 = vmatpush1.bf16.msra.mxu1 %v3121_v37  ;;  %1711 = vmatpush1.bf16.msra.mxu0 %v3123_v38  ;;  %v3917_v13 = vpack.c.bf16 %v660_v9, %v659_v8  ;;  %v585_v20 = vadd.f32 %v3770_v28, %v584_v10  ;;  %v665_v32 = vmax.f32 %v593_v27, 0.0 }
  0xff   : > { %1519 = vmatprep.subr.bf16.mxu1 %v3114_v40  ;;  %1712 = vmatprep.subr.bf16.mxu0 %v3116_v41  ;;  %v3347_v14 = vpop.f32.mrf.mxu0 }
 0x100   : > { %1184 = vmatmul.mubr.bf16.gmra.mxu1 %v3890_v49  ;;  %1377 = vmatmul.mubr.bf16.gmra.mxu0 %v3890_v49  ;;  %v663_v23 = vmax.f32 %v585_v20, 0.0  ;;  %v596_v29 = vadd.f32 %v3347_v14, %v3770_v28 }
 0x101   : > { %1193 = vmatprep.mubr.bf16.mxu1 %v3517_v17  ;;  %1386 = vmatprep.mubr.bf16.mxu0 %v3517_v17  ;;  %v587_v18 = vpop.f32.mrf.mxu0 }
 0x102   : > { %1520 = vmatpush1.bf16.msra.mxu1 %v3113_v47  ;;  %1713 = vmatpush1.bf16.msra.mxu0 %v3115_v48  ;;  %v588_v21 = vadd.f32 %v3770_v28, %v587_v18  ;;  %v666_v33 = vmax.f32 %v596_v29, 0.0 }
 0x103   : > { %1521 = vmatprep.subr.bf16.mxu1 %v3106_v53  ;;  %1714 = vmatprep.subr.bf16.mxu0 %v3108_v54  ;;  %v3350_v22 = vpop.f32.mrf.mxu0 }
 0x104   : > { %v664_v24 = vmax.f32 %v588_v21, 0.0  ;;  %v3939_v35 = vpack.c.bf16 %v666_v33, %v665_v32  ;;  %v609_v43 = vadd.f32 %v3350_v22, %v3770_v28 }
 0x105   : > { %v600_v25 = vpop.f32.mrf.mxu0 }
 0x106   : > { %1522 = vmatpush1.bf16.msra.mxu1 %v3105_v57  ;;  %1715 = vmatpush1.bf16.msra.mxu0 %v3107_v58  ;;  %v3933_v30 = vpack.c.bf16 %v664_v24, %v663_v23  ;;  %v601_v36 = vadd.f32 %v3770_v28, %v600_v25  ;;  %v669_v47 = vmax.f32 %v609_v43, 0.0 }
 0x107   : > { %v3351_v31 = vpop.f32.mrf.mxu0 }
 0x108   : > { %1194 = vmatmul.mubr.bf16.gmra.mxu1 %v3901_v62  ;;  %1387 = vmatmul.mubr.bf16.gmra.mxu0 %v3901_v62  ;;  %v667_v39 = vmax.f32 %v601_v36, 0.0  ;;  %v612_v44 = vadd.f32 %v3351_v31, %v3770_v28 }
 0x109   : > { %1203 = vmatprep.mubr.bf16.mxu1 %v3517_v17  ;;  %1396 = vmatprep.mubr.bf16.mxu0 %v3517_v17  ;;  %v603_v34 = vpop.f32.mrf.mxu0 }
 0x10a   : > { %v604_v37 = vadd.f32 %v3770_v28, %v603_v34  ;;  %v670_v48 = vmax.f32 %v612_v44, 0.0 }
 0x10b   : > { %v3354_v38 = vpop.f32.mrf.mxu0 }
 0x10c   : > { %v668_v40 = vmax.f32 %v604_v37, 0.0  ;;  %v3955_v51 = vpack.c.bf16 %v670_v48, %v669_v47  ;;  %v625_v58 = vadd.f32 %v3354_v38, %v3770_v28 }
 0x10d   : > { %v616_v41 = vpop.f32.mrf.mxu0 }
 0x10e   : > { %v3949_v45 = vpack.c.bf16 %v668_v40, %v667_v39  ;;  %v617_v52 = vadd.f32 %v3770_v28, %v616_v41  ;;  %v673_v63 = vmax.f32 %v625_v58, 0.0 }
 0x10f   : > { %v3355_v46 = vpop.f32.mrf.mxu0 }
 0x110   : > { %1204 = vmatmul.mubr.bf16.gmra.mxu1 %v3907_v5  ;;  %1397 = vmatmul.mubr.bf16.gmra.mxu0 %v3907_v5  ;;  %v671_v55 = vmax.f32 %v617_v52, 0.0  ;;  %v628_v59 = vadd.f32 %v3355_v46, %v3770_v28 }
 0x111   : > { %1213 = vmatprep.mubr.bf16.mxu1 %v3517_v17  ;;  %1406 = vmatprep.mubr.bf16.mxu0 %v3517_v17  ;;  %v619_v50 = vpop.f32.mrf.mxu0 }
 0x112   : > { %v620_v53 = vadd.f32 %v3770_v28, %v619_v50  ;;  %v674_v1 = vmax.f32 %v628_v59, 0.0 }
 0x113   : > { %v3358_v54 = vpop.f32.mrf.mxu0 }
 0x114   : > { %v672_v56 = vmax.f32 %v620_v53, 0.0  ;;  %v3971_v4 = vpack.c.bf16 %v674_v1, %v673_v63  ;;  %v641_v9 = vadd.f32 %v3358_v54, %v3770_v28 }
 0x115   : > { %v632_v57 = vpop.f32.mrf.mxu0 }
 0x116   : > { %v3965_v60 = vpack.c.bf16 %v672_v56, %v671_v55  ;;  %v633_v3 = vadd.f32 %v3770_v28, %v632_v57  ;;  %v677_v12 = vmax.f32 %v641_v9, 0.0 }
 0x117   : > { %v3359_v61 = vpop.f32.mrf.mxu0 }
 0x118   : > { %1214 = vmatmul.mubr.bf16.gmra.mxu1 %v3917_v13  ;;  %1407 = vmatmul.mubr.bf16.gmra.mxu0 %v3917_v13  ;;  %v675_v7 = vmax.f32 %v633_v3, 0.0  ;;  %v644_v10 = vadd.f32 %v3359_v61, %v3770_v28 }
 0x119   : > { %1223 = vmatprep.mubr.bf16.mxu1 %v3517_v17  ;;  %1416 = vmatprep.mubr.bf16.mxu0 %v3517_v17  ;;  %v635_v2 = vpop.f32.mrf.mxu0 }
 0x11a   : > { %v636_v6 = vadd.f32 %v3770_v28, %v635_v2  ;;  %v678_v14 = vmax.f32 %v644_v10, 0.0  ;;  %v5061_v28 = vlaneseq }
 0x11c   : > { %v676_v8 = vmax.f32 %v636_v6, 0.0  ;;  %v3987_v15 = vpack.c.bf16 %v678_v14, %v677_v12 }
 0x11e   : > { %v3981_v11 = vpack.c.bf16 %v676_v8, %v675_v7 }
 0x120   : > { %1224 = vmatmul.mubr.bf16.gmra.mxu1 %v3923_v19  ;;  %1417 = vmatmul.mubr.bf16.gmra.mxu0 %v3923_v19 }
 0x121   : > { %1233 = vmatprep.mubr.bf16.mxu1 %v3517_v17  ;;  %1426 = vmatprep.mubr.bf16.mxu0 %v3517_v17 }
 0x128   : > { %1234 = vmatmul.mubr.bf16.gmra.mxu1 %v3933_v30  ;;  %1427 = vmatmul.mubr.bf16.gmra.mxu0 %v3933_v30 }
 0x129   : > { %1243 = vmatprep.mubr.bf16.mxu1 %v3517_v17  ;;  %1436 = vmatprep.mubr.bf16.mxu0 %v3517_v17 }
 0x130   : > { %1244 = vmatmul.mubr.bf16.gmra.mxu1 %v3939_v35  ;;  %1437 = vmatmul.mubr.bf16.gmra.mxu0 %v3939_v35 }
 0x131   : > { %1253 = vmatprep.mubr.bf16.mxu1 %v3517_v17  ;;  %1446 = vmatprep.mubr.bf16.mxu0 %v3517_v17 }
 0x138   : > { %1254 = vmatmul.mubr.bf16.gmra.mxu1 %v3949_v45  ;;  %1447 = vmatmul.mubr.bf16.gmra.mxu0 %v3949_v45 }
 0x139   : > { %1263 = vmatprep.mubr.bf16.mxu1 %v3517_v17  ;;  %1456 = vmatprep.mubr.bf16.mxu0 %v3517_v17 }
 0x140   : > { %1264 = vmatmul.mubr.bf16.gmra.mxu1 %v3955_v51  ;;  %1457 = vmatmul.mubr.bf16.gmra.mxu0 %v3955_v51 }
 0x141   : > { %1273 = vmatprep.mubr.bf16.mxu1 %v3517_v17  ;;  %1466 = vmatprep.mubr.bf16.mxu0 %v3517_v17 }
 0x148   : > { %1274 = vmatmul.mubr.bf16.gmra.mxu1 %v3965_v60  ;;  %1467 = vmatmul.mubr.bf16.gmra.mxu0 %v3965_v60 }
 0x149   : > { %1283 = vmatprep.mubr.bf16.mxu1 %v3517_v17  ;;  %1476 = vmatprep.mubr.bf16.mxu0 %v3517_v17 }
 0x150   : > { %1284 = vmatmul.mubr.bf16.gmra.mxu1 %v3971_v4  ;;  %1477 = vmatmul.mubr.bf16.gmra.mxu0 %v3971_v4 }
 0x151   : > { %1293 = vmatprep.mubr.bf16.mxu1 %v3517_v17  ;;  %1486 = vmatprep.mubr.bf16.mxu0 %v3517_v17 }
 0x158   : > { %1294 = vmatmul.mubr.bf16.gmra.mxu1 %v3981_v11  ;;  %1487 = vmatmul.mubr.bf16.gmra.mxu0 %v3981_v11 }
 0x159   : > { %1303 = vmatprep.mubr.bf16.mxu1 %v3517_v17  ;;  %1496 = vmatprep.mubr.bf16.mxu0 %v3517_v17 }
 0x160   : > { %1304 = vmatmul.mubr.bf16.gmra.mxu1 %v3987_v15  ;;  %1497 = vmatmul.mubr.bf16.gmra.mxu0 %v3987_v15 }
 0x161   : > { %1539 = vmatprep.mubr.bf16.mxu1 %v3517_v17  ;;  %1732 = vmatprep.mubr.bf16.mxu0 %v3517_v17 }
 0x168   : > { %1540 = vmatmul.mubr.bf16.vlgmr.msra.gmra.mxu1 %v3789_v42  ;;  %1733 = vmatmul.mubr.bf16.vlgmr.msra.gmra.mxu0 %v3789_v42  ;;  %v4022_v42 = vshrl.u32 %v5061_v28, 7 }
 0x169   : > { %1549 = vmatprep.mubr.bf16.mxu1 %v3517_v17  ;;  %1742 = vmatprep.mubr.bf16.mxu0 %v3517_v17 }
 0x170   : > { %1550 = vmatmul.mubr.bf16.gmra.mxu1 %v3822_v0  ;;  %1743 = vmatmul.mubr.bf16.gmra.mxu0 %v3822_v0  ;;  %v5067_v0 = vsub.s32 0, %v4022_v42 }
 0x171   : > { %1559 = vmatprep.mubr.bf16.mxu1 %v3517_v17  ;;  %1752 = vmatprep.mubr.bf16.mxu0 %v3517_v17 }
 0x178   : > { %1560 = vmatmul.mubr.bf16.gmra.mxu1 %v3860_v26  ;;  %1753 = vmatmul.mubr.bf16.gmra.mxu0 %v3860_v26  ;;  %v5064_v26 = vsub.s32 2, %v4022_v42 }
 0x179   : > { %1569 = vmatprep.mubr.bf16.mxu1 %v3517_v17  ;;  %1762 = vmatprep.mubr.bf16.mxu0 %v3517_v17 }
 0x180   : > { %1570 = vmatmul.mubr.bf16.gmra.mxu1 %v3890_v49  ;;  %1763 = vmatmul.mubr.bf16.gmra.mxu0 %v3890_v49  ;;  %v759_v49 = vld [vmem:[%s5057_s4] sm:$0xff] }
 0x181   : > { %1579 = vmatprep.mubr.bf16.mxu1 %v3517_v17  ;;  %1772 = vmatprep.mubr.bf16.mxu0 %v3517_v17  ;;  %v4041_v16 = vrot.slane %v759_v49, %v5064_v26 }
 0x188   : > { %1580 = vmatmul.mubr.bf16.gmra.mxu1 %v3901_v62  ;;  %1773 = vmatmul.mubr.bf16.gmra.mxu0 %v3901_v62  ;;  %v5069_v62 = vsub.s32 1, %v4022_v42 }
 0x189   : > { %1589 = vmatprep.mubr.bf16.mxu1 %v3517_v17  ;;  %1782 = vmatprep.mubr.bf16.mxu0 %v3517_v17 }
 0x18a   : > { %v4047_v20 = vrot.slane %v759_v49, %v5069_v62 }
 0x190   : > { %1590 = vmatmul.mubr.bf16.gmra.mxu1 %v3907_v5  ;;  %1783 = vmatmul.mubr.bf16.gmra.mxu0 %v3907_v5  ;;  %v5065_v5 = vsub.s32 3, %v4022_v42 }
 0x191   : > { %1599 = vmatprep.mubr.bf16.mxu1 %v3517_v17  ;;  %1792 = vmatprep.mubr.bf16.mxu0 %v3517_v17 }
 0x192   : > { %v4051_v21 = vrot.slane %v759_v49, %v5065_v5 }
 0x198   : > { %1600 = vmatmul.mubr.bf16.gmra.mxu1 %v3917_v13  ;;  %1793 = vmatmul.mubr.bf16.gmra.mxu0 %v3917_v13  ;;  %v4037_v13 = vrot.slane %v759_v49, %v5067_v0 }
 0x199   : > { %1609 = vmatprep.mubr.bf16.mxu1 %v3517_v17  ;;  %1802 = vmatprep.mubr.bf16.mxu0 %v3517_v17 }
 0x1a0   : > { %1610 = vmatmul.mubr.bf16.gmra.mxu1 %v3923_v19  ;;  %1803 = vmatmul.mubr.bf16.gmra.mxu0 %v3923_v19 }
 0x1a1   : > { %1619 = vmatprep.mubr.bf16.mxu1 %v3517_v17  ;;  %1812 = vmatprep.mubr.bf16.mxu0 %v3517_v17 }
 0x1a8   : > { %v1155_v18 = vpop.f32.mrf.mxu1  ;;  %v1348_v19 = vpop.f32.mrf.mxu0  ;;  %1620 = vmatmul.mubr.bf16.gmra.mxu1 %v3933_v30  ;;  %1813 = vmatmul.mubr.bf16.gmra.mxu0 %v3933_v30 }
 0x1a9   : > { %1629 = vmatprep.mubr.bf16.mxu1 %v3517_v17  ;;  %1822 = vmatprep.mubr.bf16.mxu0 %v3517_v17  ;;  %v1156_v22 = vadd.f32 %v1155_v18, %v4037_v13  ;;  %v1349_v23 = vadd.f32 %v1348_v19, %v4041_v16 }
 0x1aa   : > { %v1157_v24 = vpop.f32.mrf.mxu1  ;;  %v1350_v25 = vpop.f32.mrf.mxu0 }
 0x1ab   : > { %v1158_v27 = vadd.f32 %v1157_v24, %v4047_v20  ;;  %v1351_v29 = vadd.f32 %v1350_v25, %v4051_v21  ;;  %v1893_v34 = vmax.f32 %v1156_v22, 0.0  ;;  %v1895_v36 = vmax.f32 %v1349_v23, 0.0 }
 0x1ac   : > { %v1159_v30 = vpop.f32.mrf.mxu1  ;;  %v1352_v31 = vpop.f32.mrf.mxu0 }
 0x1ad   : > { %v1160_v32 = vadd.f32 %v1159_v30, %v4037_v13  ;;  %v1353_v33 = vadd.f32 %v1352_v31, %v4041_v16  ;;  %v1894_v44 = vmax.f32 %v1158_v27, 0.0  ;;  %v1896_v46 = vmax.f32 %v1351_v29, 0.0 }
 0x1ae   : > { %v1161_v37 = vpop.f32.mrf.mxu1  ;;  %v1354_v38 = vpop.f32.mrf.mxu0 }
 0x1af   : > { %v1901_v39 = vmax.f32 %v1160_v32, 0.0  ;;  %v1903_v40 = vmax.f32 %v1353_v33, 0.0  ;;  %v1162_v41 = vadd.f32 %v1161_v37, %v4047_v20  ;;  %v1355_v43 = vadd.f32 %v1354_v38, %v4051_v21 }
 0x1b0   : > { %v1165_v47 = vpop.f32.mrf.mxu1  ;;  %v1358_v48 = vpop.f32.mrf.mxu0  ;;  %1630 = vmatmul.mubr.bf16.gmra.mxu1 %v3939_v35  ;;  %1823 = vmatmul.mubr.bf16.gmra.mxu0 %v3939_v35 }
 0x1b1   : > { %v2150_v50 = vadd.f32 %v1901_v39, %v1893_v34  ;;  %v2224_v52 = vadd.f32 %v1903_v40, %v1895_v36  ;;  %v1902_v53 = vmax.f32 %v1162_v41, 0.0  ;;  %v1904_v54 = vmax.f32 %v1355_v43, 0.0  ;;  %1639 = vmatprep.mubr.bf16.mxu1 %v3517_v17  ;;  %1832 = vmatprep.mubr.bf16.mxu0 %v3517_v17 }
 0x1b2   : > { %v1166_v55 = vadd.f32 %v1165_v47, %v4037_v13  ;;  %v1359_v56 = vadd.f32 %v1358_v48, %v4041_v16  ;;  %v1167_v57 = vpop.f32.mrf.mxu1  ;;  %v1360_v58 = vpop.f32.mrf.mxu0 }
 0x1b3   : > { %v2187_v59 = vadd.f32 %v1902_v53, %v1894_v44  ;;  %v2261_v61 = vadd.f32 %v1904_v54, %v1896_v46  ;;  %v1168_v63 = vadd.f32 %v1167_v57, %v4047_v20  ;;  %v1361_v35 = vadd.f32 %v1360_v58, %v4051_v21 }
 0x1b4   : > { %v1909_v1 = vmax.f32 %v1166_v55, 0.0  ;;  %v1911_v2 = vmax.f32 %v1359_v56, 0.0  ;;  %v1169_v3 = vpop.f32.mrf.mxu1  ;;  %v1362_v6 = vpop.f32.mrf.mxu0 }
 0x1b5   : > { %v1910_v7 = vmax.f32 %v1168_v63, 0.0  ;;  %v1912_v8 = vmax.f32 %v1361_v35, 0.0  ;;  %v1170_v9 = vadd.f32 %v1169_v3, %v4037_v13  ;;  %v1363_v10 = vadd.f32 %v1362_v6, %v4041_v16 }
 0x1b6   : > { %v2151_v12 = vadd.f32 %v2150_v50, %v1909_v1  ;;  %v2225_v14 = vadd.f32 %v2224_v52, %v1911_v2  ;;  %v1171_v49 = vpop.f32.mrf.mxu1  ;;  %v1364_v18 = vpop.f32.mrf.mxu0 }
 0x1b7   : > { %v2188_v19 = vadd.f32 %v2187_v59, %v1910_v7  ;;  %v2262_v22 = vadd.f32 %v2261_v61, %v1912_v8  ;;  %v1917_v23 = vmax.f32 %v1170_v9, 0.0  ;;  %v1919_v24 = vmax.f32 %v1363_v10, 0.0 }
 0x1b8   : > { %v1172_v25 = vadd.f32 %v1171_v49, %v4047_v20  ;;  %v1365_v27 = vadd.f32 %v1364_v18, %v4051_v21  ;;  %v1175_v29 = vpop.f32.mrf.mxu1  ;;  %v1368_v30 = vpop.f32.mrf.mxu0  ;;  %1640 = vmatmul.mubr.bf16.gmra.mxu1 %v3949_v45  ;;  %1833 = vmatmul.mubr.bf16.gmra.mxu0 %v3949_v45 }
 0x1b9   : > { %v2152_v31 = vadd.f32 %v2151_v12, %v1917_v23  ;;  %v2226_v32 = vadd.f32 %v2225_v14, %v1919_v24  ;;  %v1176_v33 = vadd.f32 %v1175_v29, %v4037_v13  ;;  %v1369_v34 = vadd.f32 %v1368_v30, %v4041_v16  ;;  %1649 = vmatprep.mubr.bf16.mxu1 %v3517_v17 }
 0x1ba   : > { %v1918_v36 = vmax.f32 %v1172_v25, 0.0  ;;  %v1920_v37 = vmax.f32 %v1365_v27, 0.0  ;;  %v1177_v38 = vpop.f32.mrf.mxu1  ;;  %v1370_v39 = vpop.f32.mrf.mxu0  ;;  %1842 = vmatprep.mubr.bf16.mxu0 %v3517_v17 }
 0x1bb   : > { %v1925_v40 = vmax.f32 %v1176_v33, 0.0  ;;  %v1927_v41 = vmax.f32 %v1369_v34, 0.0  ;;  %v1178_v43 = vadd.f32 %v1177_v38, %v4047_v20  ;;  %v1371_v45 = vadd.f32 %v1370_v39, %v4051_v21 }
 0x1bc   : > { %v2189_v44 = vadd.f32 %v2188_v19, %v1918_v36  ;;  %v2263_v46 = vadd.f32 %v2262_v22, %v1920_v37  ;;  %v1179_v47 = vpop.f32.mrf.mxu1  ;;  %v1372_v48 = vpop.f32.mrf.mxu0 }
 0x1bd   : > { %v2153_v50 = vadd.f32 %v2152_v31, %v1925_v40  ;;  %v2227_v52 = vadd.f32 %v2226_v32, %v1927_v41  ;;  %v1926_v53 = vmax.f32 %v1178_v43, 0.0  ;;  %v1928_v54 = vmax.f32 %v1371_v45, 0.0 }
 0x1be   : > { %v1180_v55 = vadd.f32 %v1179_v47, %v4037_v13  ;;  %v1373_v56 = vadd.f32 %v1372_v48, %v4041_v16  ;;  %v1181_v57 = vpop.f32.mrf.mxu1  ;;  %v1374_v58 = vpop.f32.mrf.mxu0 }
 0x1bf   : > { %v2190_v59 = vadd.f32 %v2189_v44, %v1926_v53  ;;  %v2264_v61 = vadd.f32 %v2263_v46, %v1928_v54  ;;  %v1182_v63 = vadd.f32 %v1181_v57, %v4047_v20  ;;  %v1375_v35 = vadd.f32 %v1374_v58, %v4051_v21 }
 0x1c0   : > { %v1933_v1 = vmax.f32 %v1180_v55, 0.0  ;;  %v1935_v2 = vmax.f32 %v1373_v56, 0.0  ;;  %v1185_v3 = vpop.f32.mrf.mxu1  ;;  %v1378_v6 = vpop.f32.mrf.mxu0  ;;  %1650 = vmatmul.mubr.bf16.gmra.mxu1 %v3955_v51  ;;  %1843 = vmatmul.mubr.bf16.gmra.mxu0 %v3955_v51 }
 0x1c1   : > { %v1934_v7 = vmax.f32 %v1182_v63, 0.0  ;;  %v1936_v8 = vmax.f32 %v1375_v35, 0.0  ;;  %v1186_v9 = vadd.f32 %v1185_v3, %v4037_v13  ;;  %v1379_v10 = vadd.f32 %v1378_v6, %v4041_v16  ;;  %1659 = vmatprep.mubr.bf16.mxu1 %v3517_v17  ;;  %1852 = vmatprep.mubr.bf16.mxu0 %v3517_v17 }
 0x1c2   : > { %v2154_v12 = vadd.f32 %v2153_v50, %v1933_v1  ;;  %v2228_v14 = vadd.f32 %v2227_v52, %v1935_v2  ;;  %v1187_v49 = vpop.f32.mrf.mxu1  ;;  %v1380_v18 = vpop.f32.mrf.mxu0 }
 0x1c3   : > { %v2191_v19 = vadd.f32 %v2190_v59, %v1934_v7  ;;  %v2265_v22 = vadd.f32 %v2264_v61, %v1936_v8  ;;  %v1941_v23 = vmax.f32 %v1186_v9, 0.0  ;;  %v1943_v24 = vmax.f32 %v1379_v10, 0.0  ;;  %v2526_v8 = vld [vmem:[%s5058_s5 + $0x78] sm:$0xff] }
 0x1c4   : > { %v1188_v51 = vadd.f32 %v1187_v49, %v4047_v20  ;;  %v1381_v25 = vadd.f32 %v1380_v18, %v4051_v21  ;;  %v1189_v27 = vpop.f32.mrf.mxu1  ;;  %v1382_v29 = vpop.f32.mrf.mxu0 }
 0x1c5   : > { %v2155_v30 = vadd.f32 %v2154_v12, %v1941_v23  ;;  %v2229_v31 = vadd.f32 %v2228_v14, %v1943_v24  ;;  %v1190_v32 = vadd.f32 %v1189_v27, %v4037_v13  ;;  %v1383_v33 = vadd.f32 %v1382_v29, %v4041_v16 }
 0x1c6   : > { %v1942_v34 = vmax.f32 %v1188_v51, 0.0  ;;  %v1944_v36 = vmax.f32 %v1381_v25, 0.0  ;;  %v1191_v37 = vpop.f32.mrf.mxu1  ;;  %v1384_v38 = vpop.f32.mrf.mxu0 }
 0x1c7   : > { %v1949_v39 = vmax.f32 %v1190_v32, 0.0  ;;  %v1951_v40 = vmax.f32 %v1383_v33, 0.0  ;;  %v1192_v41 = vadd.f32 %v1191_v37, %v4047_v20  ;;  %v1385_v43 = vadd.f32 %v1384_v38, %v4051_v21 }
 0x1c8   : > { %v2192_v45 = vadd.f32 %v2191_v19, %v1942_v34  ;;  %v2266_v44 = vadd.f32 %v2265_v22, %v1944_v36  ;;  %v1195_v46 = vpop.f32.mrf.mxu1  ;;  %v1388_v47 = vpop.f32.mrf.mxu0  ;;  %1660 = vmatmul.mubr.bf16.gmra.mxu1 %v3965_v60  ;;  %1853 = vmatmul.mubr.bf16.gmra.mxu0 %v3965_v60  ;;  %v2542_v60 = vld [vmem:[%s5058_s5 + $0xf8] sm:$0xff] }
 0x1c9   : > { %v2156_v48 = vadd.f32 %v2155_v30, %v1949_v39  ;;  %v2230_v50 = vadd.f32 %v2229_v31, %v1951_v40  ;;  %v1950_v52 = vmax.f32 %v1192_v41, 0.0  ;;  %v1952_v53 = vmax.f32 %v1385_v43, 0.0  ;;  %1669 = vmatprep.mubr.bf16.mxu1 %v3517_v17  ;;  %1862 = vmatprep.mubr.bf16.mxu0 %v3517_v17  ;;  %v2541_v41 = vld [vmem:[%s5058_s5 + $0xf0] sm:$0xff] }
 0x1ca   : > { %v1196_v54 = vadd.f32 %v1195_v46, %v4037_v13  ;;  %v1389_v55 = vadd.f32 %v1388_v47, %v4041_v16  ;;  %v1197_v56 = vpop.f32.mrf.mxu1  ;;  %v1390_v57 = vpop.f32.mrf.mxu0  ;;  %3186 = vmatprep.subr.mxu1 %v2542_v60 }
 0x1cb   : > { %v2193_v58 = vadd.f32 %v2192_v45, %v1950_v52  ;;  %v2267_v59 = vadd.f32 %v2266_v44, %v1952_v53  ;;  %v1391_v61 = vadd.f32 %v1390_v57, %v4051_v21  ;;  %v1198_v1 = vadd.f32 %v1197_v56, %v4047_v20  ;;  %3187 = vmatpush3.msra.mxu1 %v2526_v8 }
 0x1cc   : > { %v1957_v63 = vmax.f32 %v1196_v54, 0.0  ;;  %v1959_v35 = vmax.f32 %v1389_v55, 0.0  ;;  %v1199_v2 = vpop.f32.mrf.mxu1  ;;  %v1392_v3 = vpop.f32.mrf.mxu0  ;;  %3188 = vmatprep.subr.mxu1 %v2541_v41 }
 0x1cd   : > { %v1200_v6 = vadd.f32 %v1199_v2, %v4037_v13  ;;  %v1393_v7 = vadd.f32 %v1392_v3, %v4041_v16  ;;  %v1960_v12 = vmax.f32 %v1391_v61, 0.0  ;;  %v1958_v22 = vmax.f32 %v1198_v1, 0.0 }
 0x1ce   : > { %v2157_v9 = vadd.f32 %v2156_v48, %v1957_v63  ;;  %v2231_v10 = vadd.f32 %v2230_v50, %v1959_v35  ;;  %v1201_v14 = vpop.f32.mrf.mxu1  ;;  %v1394_v49 = vpop.f32.mrf.mxu0 }
 0x1cf   : > { %v1965_v18 = vmax.f32 %v1200_v6, 0.0  ;;  %v1967_v19 = vmax.f32 %v1393_v7, 0.0  ;;  %v1202_v23 = vadd.f32 %v1201_v14, %v4047_v20  ;;  %v1395_v24 = vadd.f32 %v1394_v49, %v4051_v21 }
 0x1d0   : > { %v1205_v51 = vpop.f32.mrf.mxu1  ;;  %v1398_v25 = vpop.f32.mrf.mxu0  ;;  %1670 = vmatmul.mubr.bf16.gmra.mxu1 %v3971_v4  ;;  %1863 = vmatmul.mubr.bf16.gmra.mxu0 %v3971_v4  ;;  %v2268_v32 = vadd.f32 %v2267_v59, %v1960_v12  ;;  %v2194_v43 = vadd.f32 %v2193_v58, %v1958_v22  ;;  %v2525_v59 = vld [vmem:[%s5058_s5 + $0x70] sm:$0xff] }
 0x1d1   : > { %v2158_v27 = vadd.f32 %v2157_v9, %v1965_v18  ;;  %v2232_v29 = vadd.f32 %v2231_v10, %v1967_v19  ;;  %v1206_v30 = vadd.f32 %v1205_v51, %v4037_v13  ;;  %v1399_v31 = vadd.f32 %v1398_v25, %v4041_v16  ;;  %1679 = vmatprep.mubr.bf16.mxu1 %v3517_v17 }
 0x1d2   : > { %v1966_v33 = vmax.f32 %v1202_v23, 0.0  ;;  %v1968_v34 = vmax.f32 %v1395_v24, 0.0  ;;  %v1207_v36 = vpop.f32.mrf.mxu1  ;;  %v1400_v37 = vpop.f32.mrf.mxu0  ;;  %1872 = vmatprep.mubr.bf16.mxu0 %v3517_v17  ;;  %3189 = vmatpush3.msra.mxu1 %v2525_v59 }
 0x1d3   : > { %v1973_v38 = vmax.f32 %v1206_v30, 0.0  ;;  %v1975_v39 = vmax.f32 %v1399_v31, 0.0  ;;  %v1208_v40 = vadd.f32 %v1207_v36, %v4047_v20  ;;  %v1401_v4 = vadd.f32 %v1400_v37, %v4051_v21 }
 0x1d4   : > { %v2269_v45 = vadd.f32 %v2268_v32, %v1968_v34  ;;  %v1209_v44 = vpop.f32.mrf.mxu1  ;;  %v1402_v46 = vpop.f32.mrf.mxu0  ;;  %v2195_v53 = vadd.f32 %v2194_v43, %v1966_v33  ;;  %v2524_v32 = vld [vmem:[%s5058_s5 + $0x68] sm:$0xff] }
 0x1d5   : > { %v2159_v47 = vadd.f32 %v2158_v27, %v1973_v38  ;;  %v2233_v48 = vadd.f32 %v2232_v29, %v1975_v39  ;;  %v1974_v50 = vmax.f32 %v1208_v40, 0.0  ;;  %v1976_v52 = vmax.f32 %v1401_v4, 0.0  ;;  %v2540_v27 = vld [vmem:[%s5058_s5 + $0xe8] sm:$0xff] }
 0x1d6   : > { %v1210_v54 = vadd.f32 %v1209_v44, %v4037_v13  ;;  %v1403_v55 = vadd.f32 %v1402_v46, %v4041_v16  ;;  %v1211_v56 = vpop.f32.mrf.mxu1  ;;  %v1404_v57 = vpop.f32.mrf.mxu0  ;;  %3190 = vmatprep.subr.mxu1 %v2540_v27 }
 0x1d7   : > { %v2270_v58 = vadd.f32 %v2269_v45, %v1976_v52  ;;  %v1212_v61 = vadd.f32 %v1211_v56, %v4047_v20  ;;  %v1405_v60 = vadd.f32 %v1404_v57, %v4051_v21  ;;  %v2196_v63 = vadd.f32 %v2195_v53, %v1974_v50  ;;  %3191 = vmatpush3.msra.mxu1 %v2524_v32 }
 0x1d8   : > { %v1981_v35 = vmax.f32 %v1210_v54, 0.0  ;;  %v1983_v1 = vmax.f32 %v1403_v55, 0.0  ;;  %v1215_v2 = vpop.f32.mrf.mxu1  ;;  %v1408_v3 = vpop.f32.mrf.mxu0  ;;  %1680 = vmatmul.mubr.bf16.gmra.mxu1 %v3981_v11  ;;  %1873 = vmatmul.mubr.bf16.gmra.mxu0 %v3981_v11 }
 0x1d9   : > { %v1982_v6 = vmax.f32 %v1212_v61, 0.0  ;;  %v1984_v7 = vmax.f32 %v1405_v60, 0.0  ;;  %v1216_v8 = vadd.f32 %v1215_v2, %v4037_v13  ;;  %v1409_v9 = vadd.f32 %v1408_v3, %v4041_v16  ;;  %1689 = vmatprep.mubr.bf16.mxu1 %v3517_v17  ;;  %1882 = vmatprep.mubr.bf16.mxu0 %v3517_v17 }
 0x1da   : > { %v2160_v10 = vadd.f32 %v2159_v47, %v1981_v35  ;;  %v2234_v12 = vadd.f32 %v2233_v48, %v1983_v1  ;;  %v1217_v14 = vpop.f32.mrf.mxu1  ;;  %v1410_v49 = vpop.f32.mrf.mxu0 }
 0x1db   : > { %v2197_v18 = vadd.f32 %v2196_v63, %v1982_v6  ;;  %v2271_v19 = vadd.f32 %v2270_v58, %v1984_v7  ;;  %v1989_v22 = vmax.f32 %v1216_v8, 0.0  ;;  %v1991_v23 = vmax.f32 %v1409_v9, 0.0  ;;  %v2523_v7 = vld [vmem:[%s5058_s5 + $0x60] sm:$0xff] }
 0x1dc   : > { %v1218_v11 = vadd.f32 %v1217_v14, %v4047_v20  ;;  %v1411_v24 = vadd.f32 %v1410_v49, %v4051_v21  ;;  %v1219_v51 = vpop.f32.mrf.mxu1  ;;  %v1412_v25 = vpop.f32.mrf.mxu0 }
 0x1dd   : > { %v2161_v29 = vadd.f32 %v2160_v10, %v1989_v22  ;;  %v2235_v17 = vadd.f32 %v2234_v12, %v1991_v23  ;;  %v1220_v30 = vadd.f32 %v1219_v51, %v4037_v13  ;;  %v1413_v31 = vadd.f32 %v1412_v25, %v4041_v16 }
 0x1de   : > { %v1990_v33 = vmax.f32 %v1218_v11, 0.0  ;;  %v1992_v34 = vmax.f32 %v1411_v24, 0.0  ;;  %v1221_v36 = vpop.f32.mrf.mxu1  ;;  %v1414_v37 = vpop.f32.mrf.mxu0 }
 0x1df   : > { %v1997_v38 = vmax.f32 %v1220_v30, 0.0  ;;  %v1999_v39 = vmax.f32 %v1413_v31, 0.0  ;;  %v1222_v40 = vadd.f32 %v1221_v36, %v4047_v20  ;;  %v1415_v4 = vadd.f32 %v1414_v37, %v4051_v21 }
 0x1e0   : > { %v2198_v41 = vadd.f32 %v2197_v18, %v1990_v33  ;;  %v2272_v43 = vadd.f32 %v2271_v19, %v1992_v34  ;;  %v1225_v45 = vpop.f32.mrf.mxu1  ;;  %v1418_v44 = vpop.f32.mrf.mxu0  ;;  %1690 = vmatmul.mubr.bf16.gmra.mxu1 %v3987_v15  ;;  %1883 = vmatmul.mubr.bf16.gmra.mxu0 %v3987_v15  ;;  %v2539_v15 = vld [vmem:[%s5058_s5 + $0xe0] sm:$0xff] }
 0x1e1   : > { %v2162_v46 = vadd.f32 %v2161_v29, %v1997_v38  ;;  %v2236_v47 = vadd.f32 %v2235_v17, %v1999_v39  ;;  %v1998_v48 = vmax.f32 %v1222_v40, 0.0  ;;  %v2000_v50 = vmax.f32 %v1415_v4, 0.0  ;;  %3192 = vmatprep.subr.mxu1 %v2539_v15  ;;  %v2538_v38 = vld [vmem:[%s5058_s5 + $0xd8] sm:$0xff] }
 0x1e2   : > { %v1226_v52 = vadd.f32 %v1225_v45, %v4037_v13  ;;  %v1419_v53 = vadd.f32 %v1418_v44, %v4041_v16  ;;  %v1227_v54 = vpop.f32.mrf.mxu1  ;;  %v1420_v55 = vpop.f32.mrf.mxu0  ;;  %3193 = vmatpush3.msra.mxu1 %v2523_v7 }
 0x1e3   : > { %v2199_v56 = vadd.f32 %v2198_v41, %v1998_v48  ;;  %v2273_v57 = vadd.f32 %v2272_v43, %v2000_v50  ;;  %v1228_v59 = vadd.f32 %v1227_v54, %v4047_v20  ;;  %v1421_v58 = vadd.f32 %v1420_v55, %v4051_v21  ;;  %3194 = vmatprep.subr.mxu1 %v2538_v38 }
 0x1e4   : > { %v2005_v61 = vmax.f32 %v1226_v52, 0.0  ;;  %v2007_v60 = vmax.f32 %v1419_v53, 0.0  ;;  %v1229_v63 = vpop.f32.mrf.mxu1  ;;  %v1422_v35 = vpop.f32.mrf.mxu0  ;;  %v2522_v53 = vld [vmem:[%s5058_s5 + $0x58] sm:$0xff] }
 0x1e5   : > { %v2006_v1 = vmax.f32 %v1228_v59, 0.0  ;;  %v2008_v2 = vmax.f32 %v1421_v58, 0.0  ;;  %v1230_v3 = vadd.f32 %v1229_v63, %v4037_v13  ;;  %v1423_v6 = vadd.f32 %v1422_v35, %v4041_v16  ;;  %3195 = vmatpush3.msra.mxu1 %v2522_v53 }
 0x1e6   : > { %v2163_v8 = vadd.f32 %v2162_v46, %v2005_v61  ;;  %v2237_v9 = vadd.f32 %v2236_v47, %v2007_v60  ;;  %v1231_v10 = vpop.f32.mrf.mxu1  ;;  %v1424_v12 = vpop.f32.mrf.mxu0 }
 0x1e7   : > { %v2200_v14 = vadd.f32 %v2199_v56, %v2006_v1  ;;  %v2274_v49 = vadd.f32 %v2273_v57, %v2008_v2  ;;  %v2013_v18 = vmax.f32 %v1230_v3, 0.0  ;;  %v2015_v19 = vmax.f32 %v1423_v6, 0.0 }
 0x1e8   : > { %v1232_v22 = vadd.f32 %v1231_v10, %v4047_v20  ;;  %v1425_v23 = vadd.f32 %v1424_v12, %v4051_v21  ;;  %v1235_v11 = vpop.f32.mrf.mxu1  ;;  %v1428_v24 = vpop.f32.mrf.mxu0 }
 0x1e9   : > { %v2164_v51 = vadd.f32 %v2163_v8, %v2013_v18  ;;  %v2238_v25 = vadd.f32 %v2237_v9, %v2015_v19  ;;  %v1236_v27 = vadd.f32 %v1235_v11, %v4037_v13  ;;  %v1429_v29 = vadd.f32 %v1428_v24, %v4041_v16 }
 0x1ea   : > { %v2014_v17 = vmax.f32 %v1232_v22, 0.0  ;;  %v2016_v30 = vmax.f32 %v1425_v23, 0.0  ;;  %v1237_v31 = vpop.f32.mrf.mxu1  ;;  %v1430_v32 = vpop.f32.mrf.mxu0  ;;  %v2537_v22 = vld [vmem:[%s5058_s5 + $0xd0] sm:$0xff] }
 0x1eb   : > { %v2021_v33 = vmax.f32 %v1236_v27, 0.0  ;;  %v2023_v34 = vmax.f32 %v1429_v29, 0.0  ;;  %v1238_v36 = vadd.f32 %v1237_v31, %v4047_v20  ;;  %v1431_v37 = vadd.f32 %v1430_v32, %v4051_v21  ;;  %3196 = vmatprep.subr.mxu1 %v2537_v22 }
 0x1ec   : > { %v2201_v39 = vadd.f32 %v2200_v14, %v2014_v17  ;;  %v2275_v40 = vadd.f32 %v2274_v49, %v2016_v30  ;;  %v1239_v4 = vpop.f32.mrf.mxu1  ;;  %v1432_v41 = vpop.f32.mrf.mxu0 }
 0x1ed   : > { %v2165_v43 = vadd.f32 %v2164_v51, %v2021_v33  ;;  %v2239_v45 = vadd.f32 %v2238_v25, %v2023_v34  ;;  %v2022_v44 = vmax.f32 %v1238_v36, 0.0  ;;  %v2024_v46 = vmax.f32 %v1431_v37, 0.0  ;;  %v2521_v25 = vld [vmem:[%s5058_s5 + $0x50] sm:$0xff] }
 0x1ee   : > { %v1240_v47 = vadd.f32 %v1239_v4, %v4037_v13  ;;  %v1433_v48 = vadd.f32 %v1432_v41, %v4041_v16  ;;  %v1241_v50 = vpop.f32.mrf.mxu1  ;;  %v1434_v52 = vpop.f32.mrf.mxu0  ;;  %3197 = vmatpush3.msra.mxu1 %v2521_v25 }
 0x1ef   : > { %v2202_v54 = vadd.f32 %v2201_v39, %v2022_v44  ;;  %v2276_v55 = vadd.f32 %v2275_v40, %v2024_v46  ;;  %v1242_v56 = vadd.f32 %v1241_v50, %v4047_v20  ;;  %v1435_v57 = vadd.f32 %v1434_v52, %v4051_v21 }
 0x1f0   : > { %v2029_v59 = vmax.f32 %v1240_v47, 0.0  ;;  %v2031_v58 = vmax.f32 %v1433_v48, 0.0  ;;  %v1245_v15 = vpop.f32.mrf.mxu1  ;;  %v1438_v61 = vpop.f32.mrf.mxu0 }
 0x1f1   : > { %v2030_v60 = vmax.f32 %v1242_v56, 0.0  ;;  %v2032_v63 = vmax.f32 %v1435_v57, 0.0  ;;  %v1246_v35 = vadd.f32 %v1245_v15, %v4037_v13  ;;  %v1439_v1 = vadd.f32 %v1438_v61, %v4041_v16 }
 0x1f2   : > { %v2166_v2 = vadd.f32 %v2165_v43, %v2029_v59  ;;  %v2240_v3 = vadd.f32 %v2239_v45, %v2031_v58  ;;  %v1247_v6 = vpop.f32.mrf.mxu1  ;;  %v1440_v7 = vpop.f32.mrf.mxu0 }
 0x1f3   : > { %v2203_v8 = vadd.f32 %v2202_v54, %v2030_v60  ;;  %v2277_v9 = vadd.f32 %v2276_v55, %v2032_v63  ;;  %v2037_v10 = vmax.f32 %v1246_v35, 0.0  ;;  %v2039_v12 = vmax.f32 %v1439_v1, 0.0  ;;  %v2536_v54 = vld [vmem:[%s5058_s5 + $0xc8] sm:$0xff] }
 0x1f4   : > { %v1248_v14 = vadd.f32 %v1247_v6, %v4047_v20  ;;  %v1441_v49 = vadd.f32 %v1440_v7, %v4051_v21  ;;  %v1249_v18 = vpop.f32.mrf.mxu1  ;;  %v1442_v19 = vpop.f32.mrf.mxu0  ;;  %3198 = vmatprep.subr.mxu1 %v2536_v54  ;;  %v2520_v63 = vld [vmem:[%s5058_s5 + $0x48] sm:$0xff] }
 0x1f5   : > { %v2167_v23 = vadd.f32 %v2166_v2, %v2037_v10  ;;  %v2241_v11 = vadd.f32 %v2240_v3, %v2039_v12  ;;  %v1250_v24 = vadd.f32 %v1249_v18, %v4037_v13  ;;  %v1443_v51 = vadd.f32 %v1442_v19, %v4041_v16  ;;  %3199 = vmatpush3.msra.mxu1 %v2520_v63 }
 0x1f6   : > { %v2038_v27 = vmax.f32 %v1248_v14, 0.0  ;;  %v2040_v29 = vmax.f32 %v1441_v49, 0.0  ;;  %v1251_v17 = vpop.f32.mrf.mxu1  ;;  %v1444_v30 = vpop.f32.mrf.mxu0 }
 0x1f7   : > { %v2045_v31 = vmax.f32 %v1250_v24, 0.0  ;;  %v2047_v32 = vmax.f32 %v1443_v51, 0.0  ;;  %v1252_v33 = vadd.f32 %v1251_v17, %v4047_v20  ;;  %v1445_v34 = vadd.f32 %v1444_v30, %v4051_v21 }
 0x1f8   : > { %v2204_v36 = vadd.f32 %v2203_v8, %v2038_v27  ;;  %v2278_v37 = vadd.f32 %v2277_v9, %v2040_v29  ;;  %v1255_v38 = vpop.f32.mrf.mxu1  ;;  %v1448_v39 = vpop.f32.mrf.mxu0 }
 0x1f9   : > { %v2168_v40 = vadd.f32 %v2167_v23, %v2045_v31  ;;  %v2242_v4 = vadd.f32 %v2241_v11, %v2047_v32  ;;  %v2046_v41 = vmax.f32 %v1252_v33, 0.0  ;;  %v2048_v43 = vmax.f32 %v1445_v34, 0.0  ;;  %v2535_v31 = vld [vmem:[%s5058_s5 + $0xc0] sm:$0xff] }
 0x1fa   : > { %v1256_v45 = vadd.f32 %v1255_v38, %v4037_v13  ;;  %v1449_v44 = vadd.f32 %v1448_v39, %v4041_v16  ;;  %v1257_v46 = vpop.f32.mrf.mxu1  ;;  %v1450_v47 = vpop.f32.mrf.mxu0  ;;  %3200 = vmatprep.subr.mxu1 %v2535_v31 }
 0x1fb   : > { %v2205_v48 = vadd.f32 %v2204_v36, %v2046_v41  ;;  %v2279_v50 = vadd.f32 %v2278_v37, %v2048_v43  ;;  %v1258_v52 = vadd.f32 %v1257_v46, %v4047_v20  ;;  %v1451_v53 = vadd.f32 %v1450_v47, %v4051_v21 }
 0x1fc   : > { %v2053_v55 = vmax.f32 %v1256_v45, 0.0  ;;  %v2055_v56 = vmax.f32 %v1449_v44, 0.0  ;;  %v1259_v57 = vpop.f32.mrf.mxu1  ;;  %v1452_v59 = vpop.f32.mrf.mxu0  ;;  %v2519_v44 = vld [vmem:[%s5058_s5 + $0x40] sm:$0xff] }
 0x1fd   : > { %v2054_v58 = vmax.f32 %v1258_v52, 0.0  ;;  %v2056_v15 = vmax.f32 %v1451_v53, 0.0  ;;  %v1260_v61 = vadd.f32 %v1259_v57, %v4037_v13  ;;  %v1453_v60 = vadd.f32 %v1452_v59, %v4041_v16  ;;  %3201 = vmatpush3.msra.mxu1 %v2519_v44  ;;  %v2589_v44 = vld [vmem:[%s5058_s5 + $0x270] sm:$0xff] }
 0x1fe   : > { %v2169_v35 = vadd.f32 %v2168_v40, %v2053_v55  ;;  %v2243_v1 = vadd.f32 %v2242_v4, %v2055_v56  ;;  %v1261_v2 = vpop.f32.mrf.mxu1  ;;  %v1454_v3 = vpop.f32.mrf.mxu0 }
 0x1ff   : > { %v2206_v6 = vadd.f32 %v2205_v48, %v2054_v58  ;;  %v2280_v7 = vadd.f32 %v2279_v50, %v2056_v15  ;;  %v2061_v8 = vmax.f32 %v1260_v61, 0.0  ;;  %v2063_v9 = vmax.f32 %v1453_v60, 0.0  ;;  %v2606_v15 = vld [vmem:[%s5058_s5 + $0x2f8] sm:$0xff] }
 0x200   : > { %v1262_v10 = vadd.f32 %v1261_v2, %v4047_v20  ;;  %v1455_v12 = vadd.f32 %v1454_v3, %v4051_v21  ;;  %v1265_v14 = vpop.f32.mrf.mxu1  ;;  %v1458_v49 = vpop.f32.mrf.mxu0  ;;  %v2590_v61 = vld [vmem:[%s5058_s5 + $0x278] sm:$0xff]  ;;  %3256 = vmatprep.subr.mxu0 %v2606_v15 }
 0x201   : > { %v2170_v18 = vadd.f32 %v2169_v35, %v2061_v8  ;;  %v2244_v19 = vadd.f32 %v2243_v1, %v2063_v9  ;;  %v1266_v22 = vadd.f32 %v1265_v14, %v4037_v13  ;;  %v1459_v23 = vadd.f32 %v1458_v49, %v4041_v16  ;;  %3257 = vmatpush3.msra.mxu0 %v2590_v61  ;;  %v2534_v14 = vld [vmem:[%s5058_s5 + $0xb8] sm:$0xff]  ;;  %v2517_v61 = vld [vmem:[%s5058_s5 + $0x30] sm:$0xff] }
 0x202   : > { %v2062_v11 = vmax.f32 %v1262_v10, 0.0  ;;  %v2064_v24 = vmax.f32 %v1455_v12, 0.0  ;;  %v1267_v51 = vpop.f32.mrf.mxu1  ;;  %v1460_v25 = vpop.f32.mrf.mxu0  ;;  %3202 = vmatprep.subr.mxu1 %v2534_v14 }
 0x203   : > { %v2069_v27 = vmax.f32 %v1266_v22, 0.0  ;;  %v2071_v29 = vmax.f32 %v1459_v23, 0.0  ;;  %v1268_v17 = vadd.f32 %v1267_v51, %v4047_v20  ;;  %v1461_v30 = vadd.f32 %v1460_v25, %v4051_v21  ;;  %v2518_v23 = vld [vmem:[%s5058_s5 + $0x38] sm:$0xff] }
 0x204   : > { %v2207_v32 = vadd.f32 %v2206_v6, %v2062_v11  ;;  %v2281_v33 = vadd.f32 %v2280_v7, %v2064_v24  ;;  %v1269_v34 = vpop.f32.mrf.mxu1  ;;  %v1462_v36 = vpop.f32.mrf.mxu0  ;;  %3203 = vmatpush3.msra.mxu1 %v2518_v23  ;;  %v2588_v23 = vld [vmem:[%s5058_s5 + $0x268] sm:$0xff] }
 0x205   : > { %v2171_v37 = vadd.f32 %v2170_v18, %v2069_v27  ;;  %v2245_v38 = vadd.f32 %v2244_v19, %v2071_v29  ;;  %v2070_v39 = vmax.f32 %v1268_v17, 0.0  ;;  %v2072_v40 = vmax.f32 %v1461_v30, 0.0 }
 0x206   : > { %v1270_v4 = vadd.f32 %v1269_v34, %v4037_v13  ;;  %v1463_v41 = vadd.f32 %v1462_v36, %v4041_v16  ;;  %v1271_v43 = vpop.f32.mrf.mxu1  ;;  %v1464_v45 = vpop.f32.mrf.mxu0 }
 0x207   : > { %v2208_v46 = vadd.f32 %v2207_v32, %v2070_v39  ;;  %v2282_v47 = vadd.f32 %v2281_v33, %v2072_v40  ;;  %v1272_v48 = vadd.f32 %v1271_v43, %v4047_v20  ;;  %v1465_v50 = vadd.f32 %v1464_v45, %v4051_v21  ;;  %v2605_v45 = vld [vmem:[%s5058_s5 + $0x2f0] sm:$0xff] }
 0x208   : > { %v2077_v52 = vmax.f32 %v1270_v4, 0.0  ;;  %v2079_v53 = vmax.f32 %v1463_v41, 0.0  ;;  %v1275_v54 = vpop.f32.mrf.mxu1  ;;  %v1468_v55 = vpop.f32.mrf.mxu0  ;;  %3258 = vmatprep.subr.mxu0 %v2605_v45 }
 0x209   : > { %v2078_v56 = vmax.f32 %v1272_v48, 0.0  ;;  %v2080_v57 = vmax.f32 %v1465_v50, 0.0  ;;  %v1276_v59 = vadd.f32 %v1275_v54, %v4037_v13  ;;  %v1469_v58 = vadd.f32 %v1468_v55, %v4041_v16  ;;  %3259 = vmatpush3.msra.mxu0 %v2589_v44  ;;  %v2516_v44 = vld [vmem:[%s5058_s5 + $0x28] sm:$0xff] }
 0x20a   : > { %v2172_v60 = vadd.f32 %v2171_v37, %v2077_v52  ;;  %v2246_v63 = vadd.f32 %v2245_v38, %v2079_v53  ;;  %v1277_v35 = vpop.f32.mrf.mxu1  ;;  %v1470_v1 = vpop.f32.mrf.mxu0  ;;  %v2533_v52 = vld [vmem:[%s5058_s5 + $0xb0] sm:$0xff] }
 0x20b   : > { %v2209_v2 = vadd.f32 %v2208_v46, %v2078_v56  ;;  %v2283_v3 = vadd.f32 %v2282_v47, %v2080_v57  ;;  %v2085_v6 = vmax.f32 %v1276_v59, 0.0  ;;  %v2087_v7 = vmax.f32 %v1469_v58, 0.0  ;;  %3204 = vmatprep.subr.mxu1 %v2533_v52 }
 0x20c   : > { %v1278_v8 = vadd.f32 %v1277_v35, %v4047_v20  ;;  %v1471_v9 = vadd.f32 %v1470_v1, %v4051_v21  ;;  %v1279_v10 = vpop.f32.mrf.mxu1  ;;  %v1472_v12 = vpop.f32.mrf.mxu0  ;;  %3205 = vmatpush3.msra.mxu1 %v2517_v61  ;;  %v2587_v61 = vld [vmem:[%s5058_s5 + $0x260] sm:$0xff] }
 0x20d   : > { %v2173_v49 = vadd.f32 %v2172_v60, %v2085_v6  ;;  %v2247_v18 = vadd.f32 %v2246_v63, %v2087_v7  ;;  %v1280_v19 = vadd.f32 %v1279_v10, %v4037_v13  ;;  %v1473_v22 = vadd.f32 %v1472_v12, %v4041_v16 }
 0x20e   : > { %v2086_v11 = vmax.f32 %v1278_v8, 0.0  ;;  %v2088_v24 = vmax.f32 %v1471_v9, 0.0  ;;  %v1281_v51 = vpop.f32.mrf.mxu1  ;;  %v1474_v25 = vpop.f32.mrf.mxu0 }
 0x20f   : > { %v2093_v27 = vmax.f32 %v1280_v19, 0.0  ;;  %v2095_v29 = vmax.f32 %v1473_v22, 0.0  ;;  %v1282_v17 = vadd.f32 %v1281_v51, %v4047_v20  ;;  %v1475_v30 = vadd.f32 %v1474_v25, %v4051_v21  ;;  %v2604_v22 = vld [vmem:[%s5058_s5 + $0x2e8] sm:$0xff] }
 0x210   : > { %v2210_v31 = vadd.f32 %v2209_v2, %v2086_v11  ;;  %v2284_v32 = vadd.f32 %v2283_v3, %v2088_v24  ;;  %v1285_v33 = vpop.f32.mrf.mxu1  ;;  %v1478_v34 = vpop.f32.mrf.mxu0  ;;  %3260 = vmatprep.subr.mxu0 %v2604_v22 }
 0x211   : > { %v2174_v36 = vadd.f32 %v2173_v49, %v2093_v27  ;;  %v2248_v37 = vadd.f32 %v2247_v18, %v2095_v29  ;;  %v2094_v38 = vmax.f32 %v1282_v17, 0.0  ;;  %v2096_v39 = vmax.f32 %v1475_v30, 0.0  ;;  %3261 = vmatpush3.msra.mxu0 %v2588_v23  ;;  %v2515_v23 = vld [vmem:[%s5058_s5 + $0x20] sm:$0xff] }
 0x212   : > { %v1286_v40 = vadd.f32 %v1285_v33, %v4037_v13  ;;  %v1479_v4 = vadd.f32 %v1478_v34, %v4041_v16  ;;  %v1287_v41 = vpop.f32.mrf.mxu1  ;;  %v1480_v43 = vpop.f32.mrf.mxu0 }
 0x213   : > { %v2211_v46 = vadd.f32 %v2210_v31, %v2094_v38  ;;  %v2285_v47 = vadd.f32 %v2284_v32, %v2096_v39  ;;  %v1288_v48 = vadd.f32 %v1287_v41, %v4047_v20  ;;  %v1481_v50 = vadd.f32 %v1480_v43, %v4051_v21  ;;  %v2532_v31 = vld [vmem:[%s5058_s5 + $0xa8] sm:$0xff] }
 0x214   : > { %v2101_v53 = vmax.f32 %v1286_v40, 0.0  ;;  %v2103_v54 = vmax.f32 %v1479_v4, 0.0  ;;  %v1289_v55 = vpop.f32.mrf.mxu1  ;;  %v1482_v56 = vpop.f32.mrf.mxu0  ;;  %3206 = vmatprep.subr.mxu1 %v2532_v31 }
 0x215   : > { %v2102_v57 = vmax.f32 %v1288_v48, 0.0  ;;  %v2104_v59 = vmax.f32 %v1481_v50, 0.0  ;;  %v1290_v58 = vadd.f32 %v1289_v55, %v4037_v13  ;;  %v1483_v15 = vadd.f32 %v1482_v56, %v4041_v16  ;;  %3207 = vmatpush3.msra.mxu1 %v2516_v44 }
 0x216   : > { %v2175_v60 = vadd.f32 %v2174_v36, %v2101_v53  ;;  %v2249_v63 = vadd.f32 %v2248_v37, %v2103_v54  ;;  %v1291_v35 = vpop.f32.mrf.mxu1  ;;  %v1484_v1 = vpop.f32.mrf.mxu0 }
 0x217   : > { %v2212_v2 = vadd.f32 %v2211_v46, %v2102_v57  ;;  %v2286_v3 = vadd.f32 %v2285_v47, %v2104_v59  ;;  %v2109_v6 = vmax.f32 %v1290_v58, 0.0  ;;  %v2111_v7 = vmax.f32 %v1483_v15, 0.0  ;;  %v2603_v15 = vld [vmem:[%s5058_s5 + $0x2e0] sm:$0xff] }
 0x218   : > { %v1292_v8 = vadd.f32 %v1291_v35, %v4047_v20  ;;  %v1485_v9 = vadd.f32 %v1484_v1, %v4051_v21  ;;  %v1295_v10 = vpop.f32.mrf.mxu1  ;;  %v1488_v12 = vpop.f32.mrf.mxu0  ;;  %3262 = vmatprep.subr.mxu0 %v2603_v15 }
 0x219   : > { %v2176_v14 = vadd.f32 %v2175_v60, %v2109_v6  ;;  %v2250_v49 = vadd.f32 %v2249_v63, %v2111_v7  ;;  %v1296_v18 = vadd.f32 %v1295_v10, %v4037_v13  ;;  %v1489_v19 = vadd.f32 %v1488_v12, %v4041_v16  ;;  %3263 = vmatpush3.msra.mxu0 %v2587_v61 }
 0x21a   : > { %v2110_v11 = vmax.f32 %v1292_v8, 0.0  ;;  %v2112_v24 = vmax.f32 %v1485_v9, 0.0  ;;  %v1297_v51 = vpop.f32.mrf.mxu1  ;;  %v1490_v25 = vpop.f32.mrf.mxu0 }
 0x21b   : > { %v2117_v27 = vmax.f32 %v1296_v18, 0.0  ;;  %v2119_v29 = vmax.f32 %v1489_v19, 0.0  ;;  %v1298_v17 = vadd.f32 %v1297_v51, %v4047_v20  ;;  %v1491_v30 = vadd.f32 %v1490_v25, %v4051_v21 }
 0x21c   : > { %v2213_v32 = vadd.f32 %v2212_v2, %v2110_v11  ;;  %v2287_v33 = vadd.f32 %v2286_v3, %v2112_v24  ;;  %v1299_v34 = vpop.f32.mrf.mxu1  ;;  %v1492_v36 = vpop.f32.mrf.mxu0 }
 0x21d   : > { %v2177_v37 = vadd.f32 %v2176_v14, %v2117_v27  ;;  %v2251_v38 = vadd.f32 %v2250_v49, %v2119_v29  ;;  %v2118_v39 = vmax.f32 %v1298_v17, 0.0  ;;  %v2120_v40 = vmax.f32 %v1491_v30, 0.0  ;;  %v2531_v14 = vld [vmem:[%s5058_s5 + $0xa0] sm:$0xff] }
 0x21e   : > { %v1300_v4 = vadd.f32 %v1299_v34, %v4037_v13  ;;  %v1493_v41 = vadd.f32 %v1492_v36, %v4041_v16  ;;  %v1301_v43 = vpop.f32.mrf.mxu1  ;;  %v1494_v45 = vpop.f32.mrf.mxu0  ;;  %3208 = vmatprep.subr.mxu1 %v2531_v14 }
 0x21f   : > { %v2214_v46 = vadd.f32 %v2213_v32, %v2118_v39  ;;  %v2288_v47 = vadd.f32 %v2287_v33, %v2120_v40  ;;  %v1302_v48 = vadd.f32 %v1301_v43, %v4047_v20  ;;  %v1495_v50 = vadd.f32 %v1494_v45, %v4051_v21  ;;  %3209 = vmatpush3.msra.mxu1 %v2515_v23 }
 0x220   : > { %v2125_v52 = vmax.f32 %v1300_v4, 0.0  ;;  %v2127_v53 = vmax.f32 %v1493_v41, 0.0  ;;  %v1305_v54 = vpop.f32.mrf.mxu1  ;;  %v1498_v55 = vpop.f32.mrf.mxu0 }
 0x221   : > { %v2126_v56 = vmax.f32 %v1302_v48, 0.0  ;;  %v2128_v57 = vmax.f32 %v1495_v50, 0.0  ;;  %v1306_v59 = vadd.f32 %v1305_v54, %v4037_v13  ;;  %v1499_v58 = vadd.f32 %v1498_v55, %v4041_v16 }
 0x222   : > { %v2178_v60 = vadd.f32 %v2177_v37, %v2125_v52  ;;  %v2252_v63 = vadd.f32 %v2251_v38, %v2127_v53  ;;  %v1307_v35 = vpop.f32.mrf.mxu1  ;;  %v1500_v1 = vpop.f32.mrf.mxu0  ;;  %v3518_v48 = vmov 1966171168  }
 0x223   : > { %v2215_v2 = vadd.f32 %v2214_v46, %v2126_v56  ;;  %v2289_v3 = vadd.f32 %v2288_v47, %v2128_v57  ;;  %v2133_v6 = vmax.f32 %v1306_v59, 0.0  ;;  %v2135_v7 = vmax.f32 %v1499_v58, 0.0 }
 0x224   : > { %v1308_v8 = vadd.f32 %v1307_v35, %v4047_v20  ;;  %v1501_v9 = vadd.f32 %v1500_v1, %v4051_v21  ;;  %v1309_v10 = vpop.f32.mrf.mxu1  ;;  %v1502_v12 = vpop.f32.mrf.mxu0  ;;  %v2459_v50 = vunpack.c.l.s4 %v3518_v48  ;;  %v2597_v48 = vld [vmem:[%s5058_s5 + $0x2b0] sm:$0xff] }
 0x225   : > { %v2179_v49 = vadd.f32 %v2178_v60, %v2133_v6  ;;  %v2253_v18 = vadd.f32 %v2252_v63, %v2135_v7  ;;  %v1310_v19 = vadd.f32 %v1309_v10, %v4037_v13  ;;  %v1503_v22 = vadd.f32 %v1502_v12, %v4041_v16  ;;  %v2586_v10 = vld [vmem:[%s5058_s5 + $0x258] sm:$0xff] }
 0x226   : > { %v2134_v11 = vmax.f32 %v1308_v8, 0.0  ;;  %v2136_v24 = vmax.f32 %v1501_v9, 0.0  ;;  %v1311_v51 = vpop.f32.mrf.mxu1  ;;  %v1504_v25 = vpop.f32.mrf.mxu0  ;;  %v2460_v35 = vunpack.c.0.s8 %v2459_v50 }
 0x227   : > { %v2141_v27 = vmax.f32 %v1310_v19, 0.0  ;;  %v2143_v29 = vmax.f32 %v1503_v22, 0.0  ;;  %v1312_v17 = vadd.f32 %v1311_v51, %v4047_v20  ;;  %v1505_v30 = vadd.f32 %v1504_v25, %v4051_v21  ;;  %v2585_v22 = vld [vmem:[%s5058_s5 + $0x250] sm:$0xff]  ;;  %v2600_v51 = vld [vmem:[%s5058_s5 + $0x2c8] sm:$0xff] }
 0x228   : > { %v2216_v31 = vadd.f32 %v2215_v2, %v2134_v11  ;;  %v2290_v13 = vadd.f32 %v2289_v3, %v2136_v24  ;;  %v4305_v32 = vpop.f32.mrf.mxu1  ;;  %v4307_v16 = vpop.f32.mrf.mxu0  ;;  %v2602_v3 = vld [vmem:[%s5058_s5 + $0x2d8] sm:$0xff]  ;;  %v4346_v23 = vsub.s32 %v2460_v35, %v4022_v42 }
 0x229   : > { %v2180_v33 = vadd.f32 %v2179_v49, %v2141_v27  ;;  %v2254_v34 = vadd.f32 %v2253_v18, %v2143_v29  ;;  %v2142_v36 = vmax.f32 %v1312_v17, 0.0  ;;  %v2144_v37 = vmax.f32 %v1505_v30, 0.0  ;;  %3264 = vmatprep.subr.mxu0 %v2602_v3  ;;  %v2601_v49 = vld [vmem:[%s5058_s5 + $0x2d0] sm:$0xff]  ;;  %v2584_v30 = vld [vmem:[%s5058_s5 + $0x248] sm:$0xff]  ;;  %v2530_v35 = vld [vmem:[%s5058_s5 + $0x98] sm:$0xff] }
 0x22a   : > { %v4309_v38 = vpop.f32.mrf.mxu1  ;;  %v4311_v39 = vpop.f32.mrf.mxu0  ;;  %3265 = vmatpush3.msra.mxu0 %v2586_v10  ;;  %v2579_v3 = vld [vmem:[%s5058_s5 + $0x220] sm:$0xff]  ;;  %3210 = vmatprep.subr.mxu1 %v2530_v35  ;;  %v2529_v10 = vld [vmem:[%s5058_s5 + $0x90] sm:$0xff] }
 0x22b   : > { %v2181_v40 = vrot.slane %v2180_v33, 4  ;;  %v2255_v4 = vrot.slane %v2254_v34, 4  ;;  %v2217_v41 = vadd.f32 %v2216_v31, %v2142_v36  ;;  %v2291_v20 = vadd.f32 %v2290_v13, %v2144_v37  ;;  %3266 = vmatprep.subr.mxu0 %v2601_v49  ;;  %v2583_v37 = vld [vmem:[%s5058_s5 + $0x240] sm:$0xff]  ;;  %v2513_v49 = vld [vmem:[%s5058_s5 + $0x10] sm:$0xff] }
 0x22c   : > { %v4313_v43 = vpop.f32.mrf.mxu1  ;;  %v4315_v21 = vpop.f32.mrf.mxu0  ;;  %3267 = vmatpush3.msra.mxu0 %v2585_v22  ;;  %v5062_v22 = vsub.s32 6, %v4022_v42 }
 0x22d   : > { %v2182_v45 = vadd.f32 %v2181_v40, %v2180_v33  ;;  %v2256_v44 = vadd.f32 %v2255_v4, %v2254_v34  ;;  %v2218_v46 = vrot.slane %v2217_v41, 4  ;;  %v2292_v47 = vrot.slane %v2291_v20, 4  ;;  %3268 = vmatprep.subr.mxu0 %v2600_v51  ;;  %v2599_v33 = vld [vmem:[%s5058_s5 + $0x2c0] sm:$0xff] }
 0x22e   : > { %v4317_v52 = vpop.f32.mrf.mxu1  ;;  %v4319_v53 = vpop.f32.mrf.mxu0  ;;  %3269 = vmatpush3.msra.mxu0 %v2584_v30  ;;  %v2527_v30 = vld [vmem:[%s5058_s5 + $0x80] sm:$0xff] }
 0x22f   : > { %v2183_v54 = vrot.slane %v2182_v45, 2  ;;  %v2257_v55 = vrot.slane %v2256_v44, 2  ;;  %v2219_v56 = vadd.f32 %v2218_v46, %v2217_v41  ;;  %v2293_v57 = vadd.f32 %v2292_v47, %v2291_v20  ;;  %3270 = vmatprep.subr.mxu0 %v2599_v33  ;;  %v2598_v41 = vld [vmem:[%s5058_s5 + $0x2b8] sm:$0xff] }
 0x230   : > { %v4321_v59 = vpop.f32.mrf.mxu1  ;;  %v4323_v58 = vpop.f32.mrf.mxu0  ;;  %3271 = vmatpush3.msra.mxu0 %v2583_v37  ;;  %v2578_v33 = vld [vmem:[%s5058_s5 + $0x218] sm:$0xff] }
 0x231   : > { %v2184_v15 = vadd.f32 %v2183_v54, %v2182_v45  ;;  %v2258_v61 = vadd.f32 %v2257_v55, %v2256_v44  ;;  %v2220_v60 = vrot.slane %v2219_v56, 2  ;;  %v2294_v63 = vrot.slane %v2293_v57, 2  ;;  %3272 = vmatprep.subr.mxu0 %v2598_v41  ;;  %v2582_v44 = vld [vmem:[%s5058_s5 + $0x238] sm:$0xff]  ;;  %v2581_v54 = vld [vmem:[%s5058_s5 + $0x230] sm:$0xff]  ;;  %v2511_v41 = vld [vmem:[%s5058_s5] sm:$0xff] }
 0x232   : > { %v4325_v1 = vpop.f32.mrf.mxu1  ;;  %v4327_v2 = vpop.f32.mrf.mxu0  ;;  %3273 = vmatpush3.msra.mxu0 %v2582_v44  ;;  %v2577_v44 = vld [vmem:[%s5058_s5 + $0x210] sm:$0xff] }
 0x233   : > { %v2185_v6 = vrot.slane %v2184_v15, 1  ;;  %v2259_v7 = vrot.slane %v2258_v61, 1  ;;  %v2221_v8 = vadd.f32 %v2220_v60, %v2219_v56  ;;  %v2295_v9 = vadd.f32 %v2294_v63, %v2293_v57  ;;  %3274 = vmatprep.subr.mxu0 %v2597_v48  ;;  %v2596_v57 = vld [vmem:[%s5058_s5 + $0x2a8] sm:$0xff]  ;;  %v2595_v63 = vld [vmem:[%s5058_s5 + $0x2a0] sm:$0xff] }
 0x234   : > { %v4335_v12 = vpop.f32.mrf.mxu1  ;;  %v4337_v14 = vpop.f32.mrf.mxu0  ;;  %3275 = vmatpush3.msra.mxu0 %v2581_v54  ;;  %v2592_v48 = vld [vmem:[%s5058_s5 + $0x288] sm:$0xff]  ;;  %v2574_v54 = vld [vmem:[%s5058_s5 + $0x1f8] sm:$0xff] }
 0x235   : > { %v2222_v18 = vrot.slane %v2221_v8, 1  ;;  %v2296_v19 = vrot.slane %v2295_v9, 1  ;;  %v2186_v25 = vadd.f32 %v2185_v6, %v2184_v15  ;;  %v2260_v27 = vadd.f32 %v2259_v7, %v2258_v61  ;;  %3276 = vmatprep.subr.mxu0 %v2596_v57  ;;  %v2580_v15 = vld [vmem:[%s5058_s5 + $0x228] sm:$0xff]  ;;  %v3438_v57 = vld [vmem:[%s5057_s4] sm:$0xff] }
 0x236   : > { %v4348_v11 = vpop.f32.mrf.mxu1  ;;  %v4350_v24 = vpop.f32.mrf.mxu0  ;;  %3277 = vmatpush3.msra.mxu0 %v2580_v15 }
 0x237   : > { %v2223_v29 = vadd.f32 %v2222_v18, %v2221_v8  ;;  %v2297_v17 = vadd.f32 %v2296_v19, %v2295_v9  ;;  %3278 = vmatprep.subr.mxu0 %v2595_v63  ;;  %v2514_v8 = vld [vmem:[%s5058_s5 + $0x18] sm:$0xff]  ;;  %v2528_v18 = vld [vmem:[%s5058_s5 + $0x88] sm:$0xff]  ;;  %v5066_v19 = vsub.s32 4, %v4022_v42  ;;  %v4483_v63 = vrot.slane %v3438_v57, %v5062_v22 }
 0x238   : > { %v4358_v31 = vpop.f32.mrf.mxu1  ;;  %v4360_v13 = vpop.f32.mrf.mxu0  ;;  %3279 = vmatpush3.msra.mxu0 %v2579_v3  ;;  %v2594_v9 = vld [vmem:[%s5058_s5 + $0x298] sm:$0xff]  ;;  %3211 = vmatpush3.msra.mxu1 %v2514_v8  ;;  %v2576_v8 = vld [vmem:[%s5058_s5 + $0x208] sm:$0xff] }
 0x239   : > { %v2454_v34 = vcombine.low %v2186_v25, %v2223_v29  ;;  %v2455_v36 = vcombine.low %v2260_v27, %v2297_v17  ;;  %3280 = vmatprep.subr.mxu0 %v2594_v9  ;;  %3212 = vmatprep.subr.mxu1 %v2529_v10  ;;  %v2512_v27 = vld [vmem:[%s5058_s5 + $0x8] sm:$0xff]  ;;  %v5068_v29 = vsub.s32 5, %v4022_v42  ;;  %v5063_v17 = vsub.s32 7, %v4022_v42 }
 0x23a   : > { %v4368_v40 = vpop.f32.mrf.mxu1  ;;  %v4370_v4 = vpop.f32.mrf.mxu0  ;;  %3213 = vmatpush3.msra.mxu1 %v2513_v49  ;;  %3281 = vmatpush3.msra.mxu0 %v2578_v33  ;;  %v4479_v15 = vrot.slane %v3438_v57, %v5066_v19  ;;  %v2591_v49 = vld [vmem:[%s5058_s5 + $0x280] sm:$0xff] }
 0x23b   : > { %v4376_v20 = vrot.slane %v2454_v34, %v4346_v23  ;;  %v4379_v45 = vrot.slane %v2455_v36, %v4346_v23  ;;  %v2593_v34 = vld [vmem:[%s5058_s5 + $0x290] sm:$0xff]  ;;  %3214 = vmatprep.subr.mxu1 %v2528_v18  ;;  %v4494_v9 = vrot.slane %v3438_v57, %v5068_v29  ;;  %v4498_v10 = vrot.slane %v3438_v57, %v5063_v17 }
 0x23c   : > { %v4384_v46 = vpop.f32.mrf.mxu1  ;;  %v4386_v47 = vpop.f32.mrf.mxu0  ;;  %3215 = vmatpush3.msra.mxu1 %v2512_v27  ;;  %3282 = vmatprep.subr.mxu0 %v2593_v34  ;;  %v1546_v18 = vadd.f32 %v4313_v43, %v4479_v15  ;;  %v1739_v27 = vadd.f32 %v4315_v21, %v4483_v63  ;;  %v2575_v34 = vld [vmem:[%s5058_s5 + $0x200] sm:$0xff]  ;;  %v1735_v43 = vadd.f32 %v4307_v16, %v4483_v63 }
 0x23d   : > { %3216 = vmatprep.subr.mxu1 %v2527_v30  ;;  %3283 = vmatpush3.msra.mxu0 %v2577_v44  ;;  %v1548_v21 = vadd.f32 %v4317_v52, %v4494_v9  ;;  %v1741_v44 = vadd.f32 %v4319_v53, %v4498_v10  ;;  %v1552_v16 = vadd.f32 %v4321_v59, %v4479_v15 }
 0x23e   : > { %v4396_v55 = vpop.f32.mrf.mxu1  ;;  %v4398_v56 = vpop.f32.mrf.mxu0  ;;  %3217 = vmatpush3.msra.mxu1 %v2511_v41  ;;  %3284 = vmatprep.subr.mxu0 %v2592_v48  ;;  %v1542_v41 = vadd.f32 %v4305_v32, %v4479_v15  ;;  %v1737_v32 = vadd.f32 %v4311_v39, %v4498_v10  ;;  %v1745_v52 = vadd.f32 %v4323_v58, %v4483_v63  ;;  %v1907_v53 = vmax.f32 %v1739_v27, 0.0 }
 0x23f   : > { %3221 = vmatprep.subr.mxu1 %v2574_v54  ;;  %3285 = vmatpush3.msra.mxu0 %v2576_v8  ;;  %v1544_v54 = vadd.f32 %v4309_v38, %v4494_v9  ;;  %v1905_v8 = vmax.f32 %v1546_v18, 0.0  ;;  %v1747_v38 = vadd.f32 %v4327_v2, %v4498_v10  ;;  %v1556_v39 = vadd.f32 %v4335_v12, %v4479_v15 }
 0x240   : > { %v4406_v61 = vpop.f32.mrf.mxu1  ;;  %v4408_v60 = vpop.f32.mrf.mxu0  ;;  %3286 = vmatprep.subr.mxu0 %v2591_v49  ;;  %v1554_v49 = vadd.f32 %v4325_v1, %v4494_v9  ;;  %v1749_v59 = vadd.f32 %v4337_v14, %v4483_v63  ;;  %v1897_v58 = vmax.f32 %v1542_v41, 0.0  ;;  %v1906_v18 = vmax.f32 %v1548_v21, 0.0 }
 0x241   : > { %3287 = vmatpush3.msra.mxu0 %v2575_v34  ;;  %v1899_v34 = vmax.f32 %v1735_v43, 0.0  ;;  %v1908_v27 = vmax.f32 %v1741_v44, 0.0  ;;  %v1898_v5 = vmax.f32 %v1544_v54, 0.0  ;;  %v1900_v19 = vmax.f32 %v1737_v32, 0.0 }
 0x242   : > { %v4419_v6 = vpop.f32.mrf.mxu1  ;;  %v4421_v7 = vpop.f32.mrf.mxu0  ;;  %v1913_v1 = vmax.f32 %v1552_v16, 0.0  ;;  %v1915_v0 = vmax.f32 %v1745_v52, 0.0  ;;  %v2298_v29 = vadd.f32 %v1905_v8, %v1897_v58  ;;  %v1558_v12 = vadd.f32 %v4348_v11, %v4494_v9 }
 0x243   : > { %v2372_v2 = vadd.f32 %v1907_v53, %v1899_v34  ;;  %v1751_v14 = vadd.f32 %v4350_v24, %v4498_v10  ;;  %v1914_v21 = vmax.f32 %v1554_v49, 0.0  ;;  %v1916_v44 = vmax.f32 %v1747_v38, 0.0 }
 0x244   : > { %v4440_v51 = vpop.f32.mrf.mxu1  ;;  %v4442_v25 = vpop.f32.mrf.mxu0  ;;  %v1921_v62 = vmax.f32 %v1556_v39, 0.0  ;;  %v1923_v50 = vmax.f32 %v1749_v59, 0.0  ;;  %v2335_v54 = vadd.f32 %v1906_v18, %v1898_v5  ;;  %v2409_v32 = vadd.f32 %v1908_v27, %v1900_v19 }
 0x245   : > { %v1562_v16 = vadd.f32 %v4358_v31, %v4479_v15  ;;  %v1755_v52 = vadd.f32 %v4360_v13, %v4483_v63  ;;  %v2299_v24 = vadd.f32 %v2298_v29, %v1913_v1  ;;  %v2373_v53 = vadd.f32 %v2372_v2, %v1915_v0 }
 0x246   : > { %v4458_v36 = vpop.f32.mrf.mxu1  ;;  %v4460_v37 = vpop.f32.mrf.mxu0  ;;  %v1564_v49 = vadd.f32 %v4368_v40, %v4494_v9  ;;  %v1757_v38 = vadd.f32 %v4370_v4, %v4498_v10  ;;  %v1922_v5 = vmax.f32 %v1558_v12, 0.0  ;;  %v1924_v19 = vmax.f32 %v1751_v14, 0.0 }
 0x247   : > { %v1566_v31 = vadd.f32 %v4384_v46, %v4479_v15  ;;  %v1759_v13 = vadd.f32 %v4386_v47, %v4483_v63  ;;  %v2336_v29 = vadd.f32 %v2335_v54, %v1914_v21  ;;  %v2410_v0 = vadd.f32 %v2409_v32, %v1916_v44 }
 0x248   : > { %v4485_v35 = vpop.f32.mrf.mxu1  ;;  %v4487_v3 = vpop.f32.mrf.mxu0  ;;  %v2300_v58 = vadd.f32 %v2299_v24, %v1921_v62  ;;  %v2374_v34 = vadd.f32 %v2373_v53, %v1923_v50  ;;  %v1929_v40 = vmax.f32 %v1562_v16, 0.0  ;;  %v1931_v18 = vmax.f32 %v1755_v52, 0.0 }
 0x249   : > { %v1568_v4 = vadd.f32 %v4396_v55, %v4494_v9  ;;  %v1761_v27 = vadd.f32 %v4398_v56, %v4498_v10  ;;  %v1930_v47 = vmax.f32 %v1564_v49, 0.0  ;;  %v1932_v2 = vmax.f32 %v1757_v38, 0.0 }
 0x24a   : > { %v4507_v30 = vpop.f32.mrf.mxu1  ;;  %v4509_v33 = vpop.f32.mrf.mxu0  ;;  %v1572_v12 = vadd.f32 %v4406_v61, %v4479_v15  ;;  %v1765_v62 = vadd.f32 %v4408_v60, %v4483_v63  ;;  %v2337_v50 = vadd.f32 %v2336_v29, %v1922_v5  ;;  %v2411_v14 = vadd.f32 %v2410_v0, %v1924_v19 }
 0x24b   : > { %v1937_v21 = vmax.f32 %v1566_v31, 0.0  ;;  %v1939_v44 = vmax.f32 %v1759_v13, 0.0  ;;  %v1574_v56 = vadd.f32 %v4419_v6, %v4494_v9  ;;  %v1767_v32 = vadd.f32 %v4421_v7, %v4498_v10 }
 0x24c   : > { %v4522_v57 = vpop.f32.mrf.mxu1  ;;  %v4524_v48 = vpop.f32.mrf.mxu0  ;;  %v1576_v61 = vadd.f32 %v4440_v51, %v4479_v15  ;;  %v1769_v60 = vadd.f32 %v4442_v25, %v4483_v63  ;;  %v2301_v16 = vadd.f32 %v2300_v58, %v1929_v40  ;;  %v2375_v52 = vadd.f32 %v2374_v34, %v1931_v18 }
 0x24d   : > { %v1938_v24 = vmax.f32 %v1568_v4, 0.0  ;;  %v1940_v53 = vmax.f32 %v1761_v27, 0.0  ;;  %v2338_v5 = vadd.f32 %v2337_v50, %v1930_v47  ;;  %v2412_v19 = vadd.f32 %v2411_v14, %v1932_v2 }
 0x24e   : > { %v4534_v28 = vpop.f32.mrf.mxu1  ;;  %v4536_v22 = vpop.f32.mrf.mxu0  ;;  %v1945_v6 = vmax.f32 %v1572_v12, 0.0  ;;  %v1947_v31 = vmax.f32 %v1765_v62, 0.0  ;;  %v2302_v13 = vadd.f32 %v2301_v16, %v1937_v21  ;;  %v2376_v7 = vadd.f32 %v2375_v52, %v1939_v44 }
 0x24f   : > { %v1578_v51 = vadd.f32 %v4458_v36, %v4494_v9  ;;  %v1771_v25 = vadd.f32 %v4460_v37, %v4498_v10  ;;  %v1946_v58 = vmax.f32 %v1574_v56, 0.0  ;;  %v1948_v34 = vmax.f32 %v1767_v32, 0.0 }
 0x250   : > { %v4546_v17 = vpop.f32.mrf.mxu1  ;;  %v4548_v26 = vpop.f32.mrf.mxu0  ;;  %v1953_v40 = vmax.f32 %v1576_v61, 0.0  ;;  %v1955_v18 = vmax.f32 %v1769_v60, 0.0  ;;  %v2339_v4 = vadd.f32 %v2338_v5, %v1938_v24  ;;  %v2413_v27 = vadd.f32 %v2412_v19, %v1940_v53 }
 0x251   : > { %v1582_v47 = vadd.f32 %v4485_v35, %v4479_v15  ;;  %v1775_v2 = vadd.f32 %v4487_v3, %v4483_v63  ;;  %v2303_v37 = vadd.f32 %v2302_v13, %v1945_v6  ;;  %v2377_v62 = vadd.f32 %v2376_v7, %v1947_v31 }
 0x252   : > { %v4554_v41 = vpop.f32.mrf.mxu1  ;;  %v4556_v43 = vpop.f32.mrf.mxu0  ;;  %v1584_v50 = vadd.f32 %v4507_v30, %v4494_v9  ;;  %v1777_v14 = vadd.f32 %v4509_v33, %v4498_v10  ;;  %v1954_v21 = vmax.f32 %v1578_v51, 0.0  ;;  %v1956_v44 = vmax.f32 %v1771_v25, 0.0 }
 0x253   : > { %v1586_v35 = vadd.f32 %v4522_v57, %v4479_v15  ;;  %v1779_v3 = vadd.f32 %v4524_v48, %v4483_v63  ;;  %v2340_v61 = vadd.f32 %v2339_v4, %v1946_v58  ;;  %v2414_v60 = vadd.f32 %v2413_v27, %v1948_v34 }
 0x254   : > { %v4562_v11 = vpop.f32.mrf.mxu1  ;;  %v4564_v8 = vpop.f32.mrf.mxu0  ;;  %v2304_v16 = vadd.f32 %v2303_v37, %v1953_v40  ;;  %v2378_v52 = vadd.f32 %v2377_v62, %v1955_v18  ;;  %v1961_v30 = vmax.f32 %v1582_v47, 0.0  ;;  %v1963_v24 = vmax.f32 %v1775_v2, 0.0 }
 0x255   : > { %v1588_v33 = vadd.f32 %v4534_v28, %v4494_v9  ;;  %v1781_v53 = vadd.f32 %v4536_v22, %v4498_v10  ;;  %v1962_v48 = vmax.f32 %v1584_v50, 0.0  ;;  %v1964_v19 = vmax.f32 %v1777_v14, 0.0 }
 0x256   : > { %v4574_v39 = vpop.f32.mrf.mxu1  ;;  %v4576_v59 = vpop.f32.mrf.mxu0  ;;  %v1592_v6 = vadd.f32 %v4546_v17, %v4479_v15  ;;  %v1785_v31 = vadd.f32 %v4548_v26, %v4483_v63  ;;  %v2341_v13 = vadd.f32 %v2340_v61, %v1954_v21  ;;  %v2415_v7 = vadd.f32 %v2414_v60, %v1956_v44 }
 0x257   : > { %v1969_v51 = vmax.f32 %v1586_v35, 0.0  ;;  %v1971_v25 = vmax.f32 %v1779_v3, 0.0  ;;  %v1594_v22 = vadd.f32 %v4554_v41, %v4494_v9  ;;  %v1787_v34 = vadd.f32 %v4556_v43, %v4498_v10 }
 0x258   : > { %v4582_v46 = vpop.f32.mrf.mxu1  ;;  %v4584_v1 = vpop.f32.mrf.mxu0  ;;  %v1596_v17 = vadd.f32 %v4562_v11, %v4479_v15  ;;  %v1789_v26 = vadd.f32 %v4564_v8, %v4483_v63  ;;  %v2305_v40 = vadd.f32 %v2304_v16, %v1961_v30  ;;  %v2379_v18 = vadd.f32 %v2378_v52, %v1963_v24 }
 0x259   : > { %v1970_v4 = vmax.f32 %v1588_v33, 0.0  ;;  %v1972_v27 = vmax.f32 %v1781_v53, 0.0  ;;  %v2342_v37 = vadd.f32 %v2341_v13, %v1962_v48  ;;  %v2416_v62 = vadd.f32 %v2415_v7, %v1964_v19 }
 0x25a   : > { %v4590_v55 = vpop.f32.mrf.mxu1  ;;  %v4592_v54 = vpop.f32.mrf.mxu0  ;;  %v1977_v41 = vmax.f32 %v1592_v6, 0.0  ;;  %v1979_v50 = vmax.f32 %v1785_v31, 0.0  ;;  %v2306_v14 = vadd.f32 %v2305_v40, %v1969_v51  ;;  %v2380_v43 = vadd.f32 %v2379_v18, %v1971_v25 }
 0x25b   : > { %v1598_v11 = vadd.f32 %v4574_v39, %v4494_v9  ;;  %v1791_v8 = vadd.f32 %v4576_v59, %v4498_v10  ;;  %v1978_v35 = vmax.f32 %v1594_v22, 0.0  ;;  %v1980_v3 = vmax.f32 %v1787_v34, 0.0 }
 0x25c   : > { %v4602_v49 = vpop.f32.mrf.mxu1  ;;  %v4604_v38 = vpop.f32.mrf.mxu0  ;;  %v1985_v61 = vmax.f32 %v1596_v17, 0.0  ;;  %v1987_v60 = vmax.f32 %v1789_v26, 0.0  ;;  %v2343_v16 = vadd.f32 %v2342_v37, %v1970_v4  ;;  %v2417_v52 = vadd.f32 %v2416_v62, %v1972_v27 }
 0x25d   : > { %v1602_v30 = vadd.f32 %v4582_v46, %v4479_v15  ;;  %v1795_v24 = vadd.f32 %v4584_v1, %v4483_v63  ;;  %v2307_v59 = vadd.f32 %v2306_v14, %v1977_v41  ;;  %v2381_v53 = vadd.f32 %v2380_v43, %v1979_v50 }
 0x25e   : > { %v4610_v29 = vpop.f32.mrf.mxu1  ;;  %v4612_v0 = vpop.f32.mrf.mxu0  ;;  %v1604_v48 = vadd.f32 %v4590_v55, %v4494_v9  ;;  %v1797_v19 = vadd.f32 %v4592_v54, %v4498_v10  ;;  %v1986_v6 = vmax.f32 %v1598_v11, 0.0  ;;  %v1988_v31 = vmax.f32 %v1791_v8, 0.0 }
 0x25f   : > { %v1606_v46 = vadd.f32 %v4602_v49, %v4479_v15  ;;  %v1799_v1 = vadd.f32 %v4604_v38, %v4483_v63  ;;  %v2344_v51 = vadd.f32 %v2343_v16, %v1978_v35  ;;  %v2418_v25 = vadd.f32 %v2417_v52, %v1980_v3 }
 0x260   : > { %v4618_v36 = vpop.f32.mrf.mxu1  ;;  %v4620_v12 = vpop.f32.mrf.mxu0  ;;  %v2308_v22 = vadd.f32 %v2307_v59, %v1985_v61  ;;  %v2382_v34 = vadd.f32 %v2381_v53, %v1987_v60  ;;  %v1993_v55 = vmax.f32 %v1602_v30, 0.0  ;;  %v1995_v17 = vmax.f32 %v1795_v24, 0.0 }
 0x261   : > { %v1608_v54 = vadd.f32 %v4610_v29, %v4494_v9  ;;  %v1801_v26 = vadd.f32 %v4612_v0, %v4498_v10  ;;  %v1994_v38 = vmax.f32 %v1604_v48, 0.0  ;;  %v1996_v18 = vmax.f32 %v1797_v19, 0.0 }
 0x262   : > { %v4630_v56 = vpop.f32.mrf.mxu1  ;;  %v4632_v32 = vpop.f32.mrf.mxu0  ;;  %v1612_v4 = vadd.f32 %v4618_v36, %v4479_v15  ;;  %v1805_v27 = vadd.f32 %v4620_v12, %v4483_v63  ;;  %v2345_v37 = vadd.f32 %v2344_v51, %v1986_v6  ;;  %v2419_v62 = vadd.f32 %v2418_v25, %v1988_v31 }
 0x263   : > { %v2001_v41 = vmax.f32 %v1606_v46, 0.0  ;;  %v2003_v50 = vmax.f32 %v1799_v1, 0.0  ;;  %v1614_v0 = vadd.f32 %v4630_v56, %v4494_v9  ;;  %v1807_v43 = vadd.f32 %v4632_v32, %v4498_v10 }
 0x264   : > { %v4638_v57 = vpop.f32.mrf.mxu1  ;;  %v4640_v5 = vpop.f32.mrf.mxu0  ;;  %v2309_v8 = vadd.f32 %v2308_v22, %v1993_v55  ;;  %v2383_v12 = vadd.f32 %v2382_v34, %v1995_v17  ;;  %v2002_v35 = vmax.f32 %v1608_v54, 0.0  ;;  %v2004_v3 = vmax.f32 %v1801_v26, 0.0 }
 0x265   : > { %v1616_v11 = vadd.f32 %v4638_v57, %v4479_v15  ;;  %v1809_v36 = vadd.f32 %v4640_v5, %v4483_v63  ;;  %v2346_v16 = vadd.f32 %v2345_v37, %v1994_v38  ;;  %v2420_v52 = vadd.f32 %v2419_v62, %v1996_v18 }
 0x266   : > { %v4646_v28 = vpop.f32.mrf.mxu1  ;;  %v4648_v58 = vpop.f32.mrf.mxu0  ;;  %v2009_v30 = vmax.f32 %v1612_v4, 0.0  ;;  %v2011_v24 = vmax.f32 %v1805_v27, 0.0  ;;  %v2310_v56 = vadd.f32 %v2309_v8, %v2001_v41  ;;  %v2384_v59 = vadd.f32 %v2383_v12, %v2003_v50 }
 0x267   : > { %v1618_v32 = vadd.f32 %v4646_v28, %v4494_v9  ;;  %v1811_v57 = vadd.f32 %v4648_v58, %v4498_v10  ;;  %v2010_v48 = vmax.f32 %v1614_v0, 0.0  ;;  %v2012_v19 = vmax.f32 %v1807_v43, 0.0 }
 0x268   : > { %v4658_v47 = vpop.f32.mrf.mxu1  ;;  %v4660_v2 = vpop.f32.mrf.mxu0  ;;  %v2017_v6 = vmax.f32 %v1616_v11, 0.0  ;;  %v2019_v31 = vmax.f32 %v1809_v36, 0.0  ;;  %v2347_v46 = vadd.f32 %v2346_v16, %v2002_v35  ;;  %v2421_v1 = vadd.f32 %v2420_v52, %v2004_v3 }
 0x269   : > { %v1622_v51 = vadd.f32 %v4658_v47, %v4479_v15  ;;  %v1815_v25 = vadd.f32 %v4660_v2, %v4483_v63  ;;  %v2311_v28 = vadd.f32 %v2310_v56, %v2009_v30  ;;  %v2385_v55 = vadd.f32 %v2384_v59, %v2011_v24 }
 0x26a   : > { %v4666_v21 = vpop.f32.mrf.mxu1  ;;  %v4668_v44 = vpop.f32.mrf.mxu0  ;;  %v2018_v54 = vmax.f32 %v1618_v32, 0.0  ;;  %v2020_v26 = vmax.f32 %v1811_v57, 0.0  ;;  %v2348_v4 = vadd.f32 %v2347_v46, %v2010_v48  ;;  %v2422_v27 = vadd.f32 %v2421_v1, %v2012_v19 }
 0x26b   : > { %v1624_v58 = vadd.f32 %v4666_v21, %v4494_v9  ;;  %v1817_v17 = vadd.f32 %v4668_v44, %v4498_v10  ;;  %v2312_v37 = vadd.f32 %v2311_v28, %v2017_v6  ;;  %v2386_v62 = vadd.f32 %v2385_v55, %v2019_v31 }
 0x26c   : > { %v4674_v39 = vpop.f32.mrf.mxu1  ;;  %v4676_v33 = vpop.f32.mrf.mxu0  ;;  %v2025_v41 = vmax.f32 %v1622_v51, 0.0  ;;  %v2027_v50 = vmax.f32 %v1815_v25, 0.0  ;;  %v2349_v8 = vadd.f32 %v2348_v4, %v2018_v54  ;;  %v2423_v12 = vadd.f32 %v2422_v27, %v2020_v26 }
 0x26d   : > { %v1626_v38 = vadd.f32 %v4674_v39, %v4479_v15  ;;  %v1819_v47 = vadd.f32 %v4676_v33, %v4483_v63  ;;  %v2026_v39 = vmax.f32 %v1624_v58, 0.0  ;;  %v2028_v11 = vmax.f32 %v1817_v17, 0.0 }
 0x26e   : > { %v4686_v13 = vpop.f32.mrf.mxu1  ;;  %v4688_v7 = vpop.f32.mrf.mxu0  ;;  %v2313_v56 = vadd.f32 %v2312_v37, %v2025_v41  ;;  %v2387_v59 = vadd.f32 %v2386_v62, %v2027_v50 }
 0x26f   : > { %v1628_v21 = vadd.f32 %v4686_v13, %v4494_v9  ;;  %v1821_v44 = vadd.f32 %v4688_v7, %v4498_v10  ;;  %v2033_v35 = vmax.f32 %v1626_v38, 0.0  ;;  %v2035_v3 = vmax.f32 %v1819_v47, 0.0 }
 0x270   : > { %v4694_v49 = vpop.f32.mrf.mxu1  ;;  %v4696_v40 = vpop.f32.mrf.mxu0  ;;  %v2350_v48 = vadd.f32 %v2349_v8, %v2026_v39  ;;  %v2424_v19 = vadd.f32 %v2423_v12, %v2028_v11 }
 0x271   : > { %v1632_v33 = vadd.f32 %v4694_v49, %v4479_v15  ;;  %v1825_v36 = vadd.f32 %v4696_v40, %v4483_v63  ;;  %v2034_v49 = vmax.f32 %v1628_v21, 0.0  ;;  %v2036_v32 = vmax.f32 %v1821_v44, 0.0 }
 0x272   : > { %v1633_v29 = vpop.f32.mrf.mxu1  ;;  %v1826_v14 = vpop.f32.mrf.mxu0  ;;  %v2314_v46 = vadd.f32 %v2313_v56, %v2033_v35  ;;  %v2388_v1 = vadd.f32 %v2387_v59, %v2035_v3 }
 0x273   : > { %v1634_v13 = vadd.f32 %v1633_v29, %v4494_v9  ;;  %v1827_v7 = vadd.f32 %v1826_v14, %v4498_v10  ;;  %v2041_v6 = vmax.f32 %v1632_v33, 0.0  ;;  %v2043_v31 = vmax.f32 %v1825_v36, 0.0 }
 0x274   : > { %v1635_v61 = vpop.f32.mrf.mxu1  ;;  %v1828_v60 = vpop.f32.mrf.mxu0  ;;  %v2351_v58 = vadd.f32 %v2350_v48, %v2034_v49  ;;  %v2425_v17 = vadd.f32 %v2424_v19, %v2036_v32 }
 0x275   : > { %v1636_v30 = vadd.f32 %v1635_v61, %v4479_v15  ;;  %v1829_v24 = vadd.f32 %v1828_v60, %v4483_v63  ;;  %v2042_v25 = vmax.f32 %v1634_v13, 0.0  ;;  %v2044_v60 = vmax.f32 %v1827_v7, 0.0 }
 0x276   : > { %v1637_v53 = vpop.f32.mrf.mxu1  ;;  %v1830_v5 = vpop.f32.mrf.mxu0  ;;  %v2315_v4 = vadd.f32 %v2314_v46, %v2041_v6  ;;  %v2389_v27 = vadd.f32 %v2388_v1, %v2043_v31 }
 0x277   : > { %v1638_v29 = vadd.f32 %v1637_v53, %v4494_v9  ;;  %v1831_v14 = vadd.f32 %v1830_v5, %v4498_v10  ;;  %v2049_v28 = vmax.f32 %v1636_v30, 0.0  ;;  %v2051_v55 = vmax.f32 %v1829_v24, 0.0 }
 0x278   : > { %v1641_v22 = vpop.f32.mrf.mxu1  ;;  %v1834_v34 = vpop.f32.mrf.mxu0  ;;  %v2352_v39 = vadd.f32 %v2351_v58, %v2042_v25 }
 0x279   : > { %v1642_v54 = vadd.f32 %v1641_v22, %v4479_v15  ;;  %v1835_v26 = vadd.f32 %v1834_v34, %v4483_v63  ;;  %v2050_v37 = vmax.f32 %v1638_v29, 0.0  ;;  %v2052_v62 = vmax.f32 %v1831_v14, 0.0 }
 0x27a   : > { %v1643_v18 = vpop.f32.mrf.mxu1  ;;  %v1836_v2 = vpop.f32.mrf.mxu0  ;;  %v2426_v22 = vadd.f32 %v2425_v17, %v2044_v60  ;;  %v2316_v11 = vadd.f32 %v2315_v4, %v2049_v28  ;;  %v2390_v34 = vadd.f32 %v2389_v27, %v2051_v55 }
 0x27b   : > { %v1644_v53 = vadd.f32 %v1643_v18, %v4494_v9  ;;  %v1837_v5 = vadd.f32 %v1836_v2, %v4498_v10  ;;  %v2057_v33 = vmax.f32 %v1642_v54, 0.0  ;;  %v2059_v36 = vmax.f32 %v1835_v26, 0.0 }
 0x27c   : > { %v1645_v0 = vpop.f32.mrf.mxu1  ;;  %v1838_v43 = vpop.f32.mrf.mxu0  ;;  %v2353_v13 = vadd.f32 %v2352_v39, %v2050_v37  ;;  %v2427_v7 = vadd.f32 %v2426_v22, %v2052_v62 }
 0x27d   : > { %v1646_v41 = vadd.f32 %v1645_v0, %v4479_v15  ;;  %v1839_v50 = vadd.f32 %v1838_v43, %v4483_v63  ;;  %v2058_v35 = vmax.f32 %v1644_v53, 0.0  ;;  %v2060_v3 = vmax.f32 %v1837_v5, 0.0 }
 0x27e   : > { %v1647_v16 = vpop.f32.mrf.mxu1  ;;  %v1840_v52 = vpop.f32.mrf.mxu0  ;;  %v2317_v48 = vadd.f32 %v2316_v11, %v2057_v33  ;;  %v2391_v19 = vadd.f32 %v2390_v34, %v2059_v36 }
 0x27f   : > { %v1648_v8 = vadd.f32 %v1647_v16, %v4494_v9  ;;  %v1841_v18 = vadd.f32 %v1840_v52, %v4498_v10  ;;  %v2065_v30 = vmax.f32 %v1646_v41, 0.0  ;;  %v2067_v24 = vmax.f32 %v1839_v50, 0.0 }
 0x280   : > { %v1651_v57 = vpop.f32.mrf.mxu1  ;;  %v1844_v40 = vpop.f32.mrf.mxu0  ;;  %v2354_v46 = vadd.f32 %v2353_v13, %v2058_v35  ;;  %v2428_v1 = vadd.f32 %v2427_v7, %v2060_v3 }
 0x281   : > { %v1652_v0 = vadd.f32 %v1651_v57, %v4479_v15  ;;  %v1845_v43 = vadd.f32 %v1844_v40, %v4483_v63  ;;  %v2066_v6 = vmax.f32 %v1648_v8, 0.0  ;;  %v2068_v57 = vmax.f32 %v1841_v18, 0.0 }
 0x282   : > { %v1653_v51 = vpop.f32.mrf.mxu1  ;;  %v1846_v61 = vpop.f32.mrf.mxu0  ;;  %v2318_v25 = vadd.f32 %v2317_v48, %v2065_v30  ;;  %v2392_v60 = vadd.f32 %v2391_v19, %v2067_v24 }
 0x283   : > { %v1654_v49 = vadd.f32 %v1653_v51, %v4494_v9  ;;  %v1847_v16 = vadd.f32 %v1846_v61, %v4498_v10  ;;  %v2073_v29 = vmax.f32 %v1652_v0, 0.0  ;;  %v2075_v14 = vmax.f32 %v1845_v43, 0.0 }
 0x284   : > { %v1655_v38 = vpop.f32.mrf.mxu1  ;;  %v1848_v47 = vpop.f32.mrf.mxu0 }
 0x285   : > { %v1656_v52 = vadd.f32 %v1655_v38, %v4479_v15  ;;  %v1849_v32 = vadd.f32 %v1848_v47, %v4483_v63  ;;  %v2074_v58 = vmax.f32 %v1654_v49, 0.0  ;;  %v2076_v17 = vmax.f32 %v1847_v16, 0.0 }
 0x286   : > { %v1657_v21 = vpop.f32.mrf.mxu1  ;;  %v1850_v44 = vpop.f32.mrf.mxu0  ;;  %v2355_v38 = vadd.f32 %v2354_v46, %v2066_v6  ;;  %v2429_v47 = vadd.f32 %v2428_v1, %v2068_v57  ;;  %v2319_v37 = vadd.f32 %v2318_v25, %v2073_v29  ;;  %v2393_v62 = vadd.f32 %v2392_v60, %v2075_v14 }
 0x287   : > { %v1658_v51 = vadd.f32 %v1657_v21, %v4494_v9  ;;  %v1851_v61 = vadd.f32 %v1850_v44, %v4498_v10  ;;  %v2081_v54 = vmax.f32 %v1656_v52, 0.0  ;;  %v2083_v26 = vmax.f32 %v1849_v32, 0.0 }
 0x288   : > { %v1661_v12 = vpop.f32.mrf.mxu1  ;;  %v1854_v2 = vpop.f32.mrf.mxu0  ;;  %v2356_v33 = vadd.f32 %v2355_v38, %v2074_v58  ;;  %v2430_v36 = vadd.f32 %v2429_v47, %v2076_v17 }
 0x289   : > { %v1662_v4 = vadd.f32 %v1661_v12, %v4479_v15  ;;  %v1855_v27 = vadd.f32 %v1854_v2, %v4483_v63  ;;  %v2082_v21 = vmax.f32 %v1658_v51, 0.0  ;;  %v2084_v44 = vmax.f32 %v1851_v61, 0.0 }
 0x28a   : > { %v1663_v56 = vpop.f32.mrf.mxu1  ;;  %v1856_v59 = vpop.f32.mrf.mxu0  ;;  %v2320_v8 = vadd.f32 %v2319_v37, %v2081_v54  ;;  %v2394_v18 = vadd.f32 %v2393_v62, %v2083_v26 }
 0x28b   : > { %v1664_v41 = vadd.f32 %v1663_v56, %v4494_v9  ;;  %v1857_v50 = vadd.f32 %v1856_v59, %v4498_v10  ;;  %v2089_v12 = vmax.f32 %v1662_v4, 0.0  ;;  %v2091_v2 = vmax.f32 %v1855_v27, 0.0 }
 0x28c   : > { %v1665_v31 = vpop.f32.mrf.mxu1  ;;  %v1858_v40 = vpop.f32.mrf.mxu0  ;;  %v2357_v56 = vadd.f32 %v2356_v33, %v2082_v21  ;;  %v2431_v59 = vadd.f32 %v2430_v36, %v2084_v44 }
 0x28d   : > { %v1666_v39 = vadd.f32 %v1665_v31, %v4479_v15  ;;  %v1859_v22 = vadd.f32 %v1858_v40, %v4483_v63  ;;  %v2090_v13 = vmax.f32 %v1664_v41, 0.0  ;;  %v2092_v7 = vmax.f32 %v1857_v50, 0.0 }
 0x28e   : > { %v1667_v28 = vpop.f32.mrf.mxu1  ;;  %v1860_v55 = vpop.f32.mrf.mxu0  ;;  %v2321_v31 = vadd.f32 %v2320_v8, %v2089_v12  ;;  %v2395_v40 = vadd.f32 %v2394_v18, %v2091_v2 }
 0x28f   : > { %v1668_v35 = vadd.f32 %v1667_v28, %v4494_v9  ;;  %v1861_v3 = vadd.f32 %v1860_v55, %v4498_v10  ;;  %v2097_v49 = vmax.f32 %v1666_v39, 0.0  ;;  %v2099_v16 = vmax.f32 %v1859_v22, 0.0 }
 0x290   : > { %v1671_v53 = vpop.f32.mrf.mxu1  ;;  %v1864_v5 = vpop.f32.mrf.mxu0  ;;  %v2358_v25 = vadd.f32 %v2357_v56, %v2090_v13  ;;  %v2432_v60 = vadd.f32 %v2431_v59, %v2092_v7 }
 0x291   : > { %v1672_v30 = vadd.f32 %v1671_v53, %v4479_v15  ;;  %v1865_v24 = vadd.f32 %v1864_v5, %v4483_v63  ;;  %v2098_v46 = vmax.f32 %v1668_v35, 0.0  ;;  %v2100_v1 = vmax.f32 %v1861_v3, 0.0 }
 0x292   : > { %v1673_v11 = vpop.f32.mrf.mxu1  ;;  %v1866_v34 = vpop.f32.mrf.mxu0  ;;  %v2322_v28 = vadd.f32 %v2321_v31, %v2097_v49  ;;  %v2396_v55 = vadd.f32 %v2395_v40, %v2099_v16 }
 0x293   : > { %v1674_v48 = vadd.f32 %v1673_v11, %v4494_v9  ;;  %v1867_v19 = vadd.f32 %v1866_v34, %v4498_v10  ;;  %v2105_v51 = vmax.f32 %v1672_v30, 0.0  ;;  %v2107_v61 = vmax.f32 %v1865_v24, 0.0 }
 0x294   : > { %v1675_v0 = vpop.f32.mrf.mxu1  ;;  %v1868_v43 = vpop.f32.mrf.mxu0  ;;  %v2359_v53 = vadd.f32 %v2358_v25, %v2098_v46  ;;  %v2433_v5 = vadd.f32 %v2432_v60, %v2100_v1 }
 0x295   : > { %v1676_v6 = vadd.f32 %v1675_v0, %v4479_v15  ;;  %v1869_v57 = vadd.f32 %v1868_v43, %v4483_v63  ;;  %v2106_v38 = vmax.f32 %v1674_v48, 0.0  ;;  %v2108_v47 = vmax.f32 %v1867_v19, 0.0 }
 0x296   : > { %v1677_v52 = vpop.f32.mrf.mxu1  ;;  %v1870_v32 = vpop.f32.mrf.mxu0  ;;  %v2323_v21 = vadd.f32 %v2322_v28, %v2105_v51  ;;  %v2397_v44 = vadd.f32 %v2396_v55, %v2107_v61 }
 0x297   : > { %v1678_v58 = vadd.f32 %v1677_v52, %v4494_v9  ;;  %v1871_v17 = vadd.f32 %v1870_v32, %v4498_v10  ;;  %v2113_v4 = vmax.f32 %v1676_v6, 0.0  ;;  %v2115_v27 = vmax.f32 %v1869_v57, 0.0 }
 0x298   : > { %v1681_v29 = vpop.f32.mrf.mxu1  ;;  %v1874_v14 = vpop.f32.mrf.mxu0  ;;  %v2360_v12 = vadd.f32 %v2359_v53, %v2106_v38  ;;  %v2434_v2 = vadd.f32 %v2433_v5, %v2108_v47 }
 0x299   : > { %v1682_v37 = vadd.f32 %v1681_v29, %v4479_v15  ;;  %v1875_v62 = vadd.f32 %v1874_v14, %v4483_v63  ;;  %v2114_v11 = vmax.f32 %v1678_v58, 0.0  ;;  %v2116_v34 = vmax.f32 %v1871_v17, 0.0 }
 0x29a   : > { %v1683_v54 = vpop.f32.mrf.mxu1  ;;  %v1876_v26 = vpop.f32.mrf.mxu0  ;;  %v2324_v35 = vadd.f32 %v2323_v21, %v2113_v4  ;;  %v2398_v3 = vadd.f32 %v2397_v44, %v2115_v27 }
 0x29b   : > { %v1684_v39 = vadd.f32 %v1683_v54, %v4494_v9  ;;  %v1877_v22 = vadd.f32 %v1876_v26, %v4498_v10  ;;  %v2121_v0 = vmax.f32 %v1682_v37, 0.0  ;;  %v2123_v43 = vmax.f32 %v1875_v62, 0.0 }
 0x29c   : > { %v1685_v41 = vpop.f32.mrf.mxu1  ;;  %v1878_v50 = vpop.f32.mrf.mxu0  ;;  %v2361_v52 = vadd.f32 %v2360_v12, %v2114_v11  ;;  %v2435_v32 = vadd.f32 %v2434_v2, %v2116_v34 }
 0x29d   : > { %v1686_v33 = vadd.f32 %v1685_v41, %v4479_v15  ;;  %v1879_v36 = vadd.f32 %v1878_v50, %v4483_v63  ;;  %v2122_v56 = vmax.f32 %v1684_v39, 0.0  ;;  %v2124_v59 = vmax.f32 %v1877_v22, 0.0 }
 0x29e   : > { %v1687_v8 = vpop.f32.mrf.mxu1  ;;  %v1880_v18 = vpop.f32.mrf.mxu0  ;;  %v2325_v29 = vadd.f32 %v2324_v35, %v2121_v0  ;;  %v2399_v14 = vadd.f32 %v2398_v3, %v2123_v43 }
 0x29f   : > { %v1688_v13 = vadd.f32 %v1687_v8, %v4494_v9  ;;  %v1881_v7 = vadd.f32 %v1880_v18, %v4498_v10  ;;  %v2129_v48 = vmax.f32 %v1686_v33, 0.0  ;;  %v2131_v19 = vmax.f32 %v1879_v36, 0.0 }
 0x2a0   : > { %v1691_v30 = vpop.f32.mrf.mxu1  ;;  %v1884_v24 = vpop.f32.mrf.mxu0  ;;  %v2362_v28 = vadd.f32 %v2361_v52, %v2122_v56  ;;  %v2436_v55 = vadd.f32 %v2435_v32, %v2124_v59 }
 0x2a1   : > { %v1692_v49 = vadd.f32 %v1691_v30, %v4479_v15  ;;  %v1885_v16 = vadd.f32 %v1884_v24, %v4483_v63  ;;  %v2130_v31 = vmax.f32 %v1688_v13, 0.0  ;;  %v2132_v40 = vmax.f32 %v1881_v7, 0.0 }
 0x2a2   : > { %v1693_v6 = vpop.f32.mrf.mxu1  ;;  %v1886_v57 = vpop.f32.mrf.mxu0  ;;  %v2326_v54 = vadd.f32 %v2325_v29, %v2129_v48  ;;  %v2400_v26 = vadd.f32 %v2399_v14, %v2131_v19  ;;  %v5072_v14 = vcombine.low %v4376_v20, %v4379_v45  ;;  %v5076_v20 = vsub.s32 4, %v4022_v42 }
 0x2a3   : > { %v1694_v46 = vadd.f32 %v1693_v6, %v4494_v9  ;;  %v1887_v1 = vadd.f32 %v1886_v57, %v4498_v10  ;;  %v2137_v25 = vmax.f32 %v1692_v49, 0.0  ;;  %v2139_v60 = vmax.f32 %v1885_v16, 0.0 }
 0x2a4   : > { %v1695_v51 = vpop.f32.mrf.mxu1  ;;  %v1888_v61 = vpop.f32.mrf.mxu0  ;;  %v2363_v53 = vadd.f32 %v2362_v28, %v2130_v31  ;;  %v2437_v5 = vadd.f32 %v2436_v55, %v2132_v40  ;;  %v5073_v28 = vsub.s32 1, %v4022_v42 }
 0x2a5   : > { %v2138_v58 = vmax.f32 %v1694_v46, 0.0  ;;  %v2140_v17 = vmax.f32 %v1887_v1, 0.0  ;;  %v1696_v38 = vadd.f32 %v1695_v51, %v4479_v15  ;;  %v1889_v47 = vadd.f32 %v1888_v61, %v4483_v63 }
 0x2a6   : > { %v1697_v4 = vpop.f32.mrf.mxu1  ;;  %v1890_v27 = vpop.f32.mrf.mxu0  ;;  %v2327_v41 = vadd.f32 %v2326_v54, %v2137_v25  ;;  %v2401_v50 = vadd.f32 %v2400_v26, %v2139_v60  ;;  %v2494_v25 = vrot.slane %v5072_v14, %v4346_v23  ;;  %v5075_v54 = vsub.s32 0, %v4022_v42  ;;  %v2616_v14 = vld [vmem:[%s5058_s5 + $0x348] sm:$0xff] }
 0x2a7   : > { %v1698_v37 = vadd.f32 %v1697_v4, %v4494_v9  ;;  %v1891_v62 = vadd.f32 %v1890_v27, %v4498_v10  ;;  %v2145_v21 = vmax.f32 %v1696_v38, 0.0  ;;  %v2147_v44 = vmax.f32 %v1889_v47, 0.0  ;;  %v2573_v38 = vld [vmem:[%s5058_s5 + $0x1f0] sm:$0xff] }
 0x2a8   : > { %v2364_v39 = vadd.f32 %v2363_v53, %v2138_v58  ;;  %v2438_v22 = vadd.f32 %v2437_v5, %v2140_v17  ;;  %v5074_v58 = vsub.s32 5, %v4022_v42  ;;  %v5077_v47 = vsub.s32 3, %v4022_v42  ;;  %v2557_v27 = vld [vmem:[%s5058_s5 + $0x170] sm:$0xff]  ;;  %v2572_v53 = vld [vmem:[%s5058_s5 + $0x1e8] sm:$0xff] }
 0x2a9   : > { %v2146_v11 = vmax.f32 %v1698_v37, 0.0  ;;  %v2148_v34 = vmax.f32 %v1891_v62, 0.0  ;;  %v2328_v33 = vadd.f32 %v2327_v41, %v2145_v21  ;;  %v2402_v15 = vadd.f32 %v2401_v50, %v2147_v44  ;;  %v2556_v5 = vld [vmem:[%s5058_s5 + $0x168] sm:$0xff]  ;;  %v2571_v37 = vld [vmem:[%s5058_s5 + $0x1e0] sm:$0xff]  ;;  %v2570_v41 = vld [vmem:[%s5058_s5 + $0x1d8] sm:$0xff] }
 0x2aa   : > { %v2555_v62 = vld [vmem:[%s5058_s5 + $0x160] sm:$0xff]  ;;  %v2554_v50 = vld [vmem:[%s5058_s5 + $0x158] sm:$0xff]  ;;  %v2569_v21 = vld [vmem:[%s5058_s5 + $0x1d0] sm:$0xff] }
 0x2ab   : > { %v2365_v36 = vadd.f32 %v2364_v39, %v2146_v11  ;;  %v2439_v63 = vadd.f32 %v2438_v22, %v2148_v34  ;;  %v2329_v8 = vrot.slane %v2328_v33, 4  ;;  %v2403_v18 = vrot.slane %v2402_v15, 4  ;;  %v2553_v44 = vld [vmem:[%s5058_s5 + $0x150] sm:$0xff]  ;;  %v2568_v39 = vld [vmem:[%s5058_s5 + $0x1c8] sm:$0xff]  ;;  %v2567_v11 = vld [vmem:[%s5058_s5 + $0x1c0] sm:$0xff] }
 0x2ac   : > { %v2552_v22 = vld [vmem:[%s5058_s5 + $0x148] sm:$0xff]  ;;  %v2551_v34 = vld [vmem:[%s5058_s5 + $0x140] sm:$0xff] }
 0x2ad   : > { %v2366_v12 = vrot.slane %v2365_v36, 4  ;;  %v2440_v2 = vrot.slane %v2439_v63, 4  ;;  %v2330_v35 = vadd.f32 %v2329_v8, %v2328_v33  ;;  %v2404_v9 = vadd.f32 %v2403_v18, %v2402_v15  ;;  %v2566_v33 = vld [vmem:[%s5058_s5 + $0x1b8] sm:$0xff]  ;;  %v2564_v8 = vld [vmem:[%s5058_s5 + $0x1a8] sm:$0xff] }
 0x2ae   : > { %v2550_v15 = vld [vmem:[%s5058_s5 + $0x138] sm:$0xff]  ;;  %v2548_v18 = vld [vmem:[%s5058_s5 + $0x128] sm:$0xff] }
 0x2af   : > { %v2367_v3 = vadd.f32 %v2366_v12, %v2365_v36  ;;  %v2441_v10 = vadd.f32 %v2440_v2, %v2439_v63  ;;  %v2331_v0 = vrot.slane %v2330_v35, 2  ;;  %v2405_v43 = vrot.slane %v2404_v9, 2  ;;  %v2565_v36 = vld [vmem:[%s5058_s5 + $0x1b0] sm:$0xff]  ;;  %v2563_v12 = vld [vmem:[%s5058_s5 + $0x1a0] sm:$0xff] }
 0x2b0   : > { %v2549_v63 = vld [vmem:[%s5058_s5 + $0x130] sm:$0xff]  ;;  %v2547_v2 = vld [vmem:[%s5058_s5 + $0x120] sm:$0xff] }
 0x2b1   : > { %v2368_v13 = vrot.slane %v2367_v3, 2  ;;  %v2442_v7 = vrot.slane %v2441_v10, 2  ;;  %v2332_v30 = vadd.f32 %v2331_v0, %v2330_v35  ;;  %v2406_v24 = vadd.f32 %v2405_v43, %v2404_v9  ;;  %v2562_v35 = vld [vmem:[%s5058_s5 + $0x198] sm:$0xff]  ;;  %v2560_v0 = vld [vmem:[%s5058_s5 + $0x188] sm:$0xff] }
 0x2b2   : > { %v2546_v9 = vld [vmem:[%s5058_s5 + $0x118] sm:$0xff]  ;;  %v2544_v43 = vld [vmem:[%s5058_s5 + $0x108] sm:$0xff] }
 0x2b3   : > { %v2369_v56 = vadd.f32 %v2368_v13, %v2367_v3  ;;  %v2443_v59 = vadd.f32 %v2442_v7, %v2441_v10  ;;  %v2333_v49 = vrot.slane %v2332_v30, 1  ;;  %v2407_v16 = vrot.slane %v2406_v24, 1  ;;  %v2561_v3 = vld [vmem:[%s5058_s5 + $0x190] sm:$0xff]  ;;  %v2559_v13 = vld [vmem:[%s5058_s5 + $0x180] sm:$0xff] }
 0x2b4   : > { %v2545_v10 = vld [vmem:[%s5058_s5 + $0x110] sm:$0xff]  ;;  %v2543_v7 = vld [vmem:[%s5058_s5 + $0x100] sm:$0xff] }
 0x2b5   : > { %v2370_v52 = vrot.slane %v2369_v56, 1  ;;  %v2444_v32 = vrot.slane %v2443_v59, 1  ;;  %v2334_v48 = vadd.f32 %v2333_v49, %v2332_v30  ;;  %v2408_v19 = vadd.f32 %v2407_v16, %v2406_v24  ;;  %v2638_v30 = vld [vmem:[%s5058_s5 + $0x3f8] sm:$0xff] }
 0x2b6   : > { %v5078_v24 = vsub.s32 2, %v4022_v42  ;;  %v5079_v49 = vsub.s32 7, %v4022_v42 }
 0x2b7   : > { %v2371_v6 = vadd.f32 %v2370_v52, %v2369_v56  ;;  %v2445_v57 = vadd.f32 %v2444_v32, %v2443_v59  ;;  %v2622_v59 = vld [vmem:[%s5058_s5 + $0x378] sm:$0xff]  ;;  %v2637_v52 = vld [vmem:[%s5058_s5 + $0x3f0] sm:$0xff] }
 0x2b8   : > { %v2621_v32 = vld [vmem:[%s5058_s5 + $0x370] sm:$0xff] }
 0x2b9   : > { %v2456_v31 = vcombine.low %v2334_v48, %v2371_v6  ;;  %v2457_v40 = vcombine.low %v2408_v19, %v2445_v57  ;;  %v2636_v48 = vld [vmem:[%s5058_s5 + $0x3e8] sm:$0xff]  ;;  %v2635_v6 = vld [vmem:[%s5058_s5 + $0x3e0] sm:$0xff] }
 0x2ba   : > { %v2620_v19 = vld [vmem:[%s5058_s5 + $0x368] sm:$0xff]  ;;  %v2619_v57 = vld [vmem:[%s5058_s5 + $0x360] sm:$0xff] }
 0x2bb   : > { %v2478_v46 = vrot.slane %v2456_v31, %v4346_v23  ;;  %v2485_v1 = vrot.slane %v2457_v40, %v4346_v23  ;;  %v2634_v31 = vld [vmem:[%s5058_s5 + $0x3d8] sm:$0xff] }
 0x2bc   : > { %v2618_v40 = vld [vmem:[%s5058_s5 + $0x358] sm:$0xff] }
 0x2bd   : > { %v2487_v29 = vcombine.low %v2478_v46, %v2485_v1  ;;  %v2633_v46 = vld [vmem:[%s5058_s5 + $0x3d0] sm:$0xff] }
 0x2be   : > { %v2617_v1 = vld [vmem:[%s5058_s5 + $0x350] sm:$0xff] }
 0x2bf   : > { %v2501_v60 = vrot.slane %v2487_v29, %v4346_v23  ;;  %v2558_v23 = vld [vmem:[%s5058_s5 + $0x178] sm:$0xff]  ;;  %v2632_v29 = vld [vmem:[%s5058_s5 + $0x3c8] sm:$0xff] }
 0x2c1   : > { %v2502_v51 = vcombine.low %v2494_v25, %v2501_v60  ;;  %v2631_v25 = vld [vmem:[%s5058_s5 + $0x3c0] sm:$0xff] }
 0x2c2   : > { %v2615_v60 = vld [vmem:[%s5058_s5 + $0x340] sm:$0xff] }
 0x2c3   : > { %v4795_v61 = vmul.f32 0.00390625, %v2502_v51  ;;  %v2630_v51 = vld [vmem:[%s5058_s5 + $0x3b8] sm:$0xff] }
 0x2c5   : > { %v2648_v55 = vrot.slane %v4795_v61, %v5073_v28  ;;  %v2664_v17 = vrot.slane %v4795_v61, %v5074_v58  ;;  %v2644_v26 = vrot.slane %v4795_v61, %v5075_v54  ;;  %v2660_v45 = vrot.slane %v4795_v61, %v5076_v20  ;;  %v2614_v28 = vld [vmem:[%s5058_s5 + $0x338] sm:$0xff]  ;;  %v2613_v58 = vld [vmem:[%s5058_s5 + $0x330] sm:$0xff]  ;;  %v2612_v54 = vld [vmem:[%s5058_s5 + $0x328] sm:$0xff] }
 0x2c6   : > { %v2656_v4 = vrot.slane %v4795_v61, %v5077_v47  ;;  %v2652_v56 = vrot.slane %v4795_v61, %v5078_v24  ;;  %v2672_v16 = vrot.slane %v4795_v61, %v5079_v49  ;;  %v2611_v20 = vld [vmem:[%s5058_s5 + $0x320] sm:$0xff]  ;;  %v2609_v47 = vld [vmem:[%s5058_s5 + $0x310] sm:$0xff] }
 0x2c7   : > { %2745 = vmatprep.mubr.f32.mxu1 %v2648_v55  ;;  %2885 = vmatprep.mubr.f32.mxu0 %v2664_v17  ;;  %v2629_v55 = vld [vmem:[%s5058_s5 + $0x3b0] sm:$0xff]  ;;  %v2628_v17 = vld [vmem:[%s5058_s5 + $0x3a8] sm:$0xff] }
 0x2c8   : > { %2746 = vmatmul.mubr.f32.vlgmr.msra.gmra.mxu1 %v2644_v26  ;;  %2886 = vmatmul.mubr.f32.vlgmr.msra.gmra.mxu0 %v2660_v45  ;;  %v2627_v26 = vld [vmem:[%s5058_s5 + $0x3a0] sm:$0xff]  ;;  %v2626_v45 = vld [vmem:[%s5058_s5 + $0x398] sm:$0xff] }
 0x2c9   : > { %3222 = vmatpush3.msra.mxu1 %v2558_v23  ;;  %2815 = vmatprep.mubr.f32.mxu1 %v2656_v4  ;;  %v2610_v23 = vld [vmem:[%s5058_s5 + $0x318] sm:$0xff]  ;;  %v2624_v4 = vld [vmem:[%s5058_s5 + $0x388] sm:$0xff] }
 0x2ca   : > { %3223 = vmatprep.subr.mxu1 %v2573_v38  ;;  %v2625_v38 = vld [vmem:[%s5058_s5 + $0x390] sm:$0xff] }
 0x2cb   : > { %3224 = vmatpush3.msra.mxu1 %v2557_v27  ;;  %v2608_v27 = vld [vmem:[%s5058_s5 + $0x308] sm:$0xff] }
 0x2cc   : > { %3225 = vmatprep.subr.mxu1 %v2572_v53  ;;  %v2623_v53 = vld [vmem:[%s5058_s5 + $0x380] sm:$0xff] }
 0x2cd   : > { %3226 = vmatpush3.msra.mxu1 %v2556_v5  ;;  %v2607_v5 = vld [vmem:[%s5058_s5 + $0x300] sm:$0xff] }
 0x2ce   : > { %3227 = vmatprep.subr.mxu1 %v2571_v37  ;;  %v5080_v37 = vsub.s32 6, %v4022_v42  ;;  %v5081_v42 = vlaneseq }
 0x2cf   : > { %3228 = vmatpush3.msra.mxu1 %v2555_v62 }
 0x2d0   : > { %3229 = vmatprep.subr.mxu1 %v2570_v41  ;;  %v2668_v62 = vrot.slane %v4795_v61, %v5080_v37 }
 0x2d1   : > { %3230 = vmatpush3.msra.mxu1 %v2554_v50 }
 0x2d2   : > { %3231 = vmatprep.subr.mxu1 %v2569_v21 }
 0x2d3   : > { %3232 = vmatpush3.msra.mxu1 %v2553_v44 }
 0x2d4   : > { %3233 = vmatprep.subr.mxu1 %v2568_v39 }
 0x2d5   : > { %3234 = vmatpush3.msra.mxu1 %v2552_v22 }
 0x2d6   : > { %3235 = vmatprep.subr.mxu1 %v2567_v11  ;;  %v2639_v11 = vld [vmem:[%s5059_s6] sm:$0x1] }
 0x2d7   : > { %3236 = vmatpush3.msra.mxu1 %v2551_v34 }
 0x2d8   : > { %3237 = vmatprep.subr.mxu1 %v2566_v33 }
 0x2d9   : > { %3238 = vmatpush3.msra.mxu1 %v2550_v15 }
 0x2da   : > { %3239 = vmatprep.subr.mxu1 %v2565_v36 }
 0x2db   : > { %3240 = vmatpush3.msra.mxu1 %v2549_v63 }
 0x2dc   : > { %3241 = vmatprep.subr.mxu1 %v2564_v8  ;;  %v2962_v8 = vand.u32 127, %v5081_v42 }
 0x2dd   : > { %3242 = vmatpush3.msra.mxu1 %v2548_v18 }
 0x2de   : > { %3243 = vmatprep.subr.mxu1 %v2563_v12  ;;  %vm2963_vm1 = vcmp.lt.s32.totalorder %v2962_v8, 10 }
 0x2df   : > { %3244 = vmatpush3.msra.mxu1 %v2547_v2 }
 0x2e0   : > { %3245 = vmatprep.subr.mxu1 %v2562_v35 }
 0x2e1   : > { %3246 = vmatpush3.msra.mxu1 %v2546_v9 }
 0x2e2   : > { %3247 = vmatprep.subr.mxu1 %v2561_v3 }
 0x2e3   : > { %3248 = vmatpush3.msra.mxu1 %v2545_v10 }
 0x2e4   : > { %3249 = vmatprep.subr.mxu1 %v2560_v0 }
 0x2e5   : > { %3250 = vmatpush3.msra.mxu1 %v2544_v43 }
 0x2e6   : > { %3251 = vmatprep.subr.mxu1 %v2559_v13 }
 0x2e7   : > { %3252 = vmatpush3.msra.mxu1 %v2543_v7 }
 0x2e8   : > { %2816 = vmatmul.mubr.f32.vlgmr.msra.gmra.mxu1 %v2652_v56  ;;  %3291 = vmatprep.subr.mxu1 %v2638_v30 }
 0x2e9   : > { %3292 = vmatpush3.msra.mxu1 %v2622_v59  ;;  %2955 = vmatprep.mubr.f32.mxu1 %v2672_v16 }
 0x2ea   : > { %3293 = vmatprep.subr.mxu1 %v2637_v52 }
 0x2eb   : > { %3294 = vmatpush3.msra.mxu1 %v2621_v32 }
 0x2ec   : > { %3295 = vmatprep.subr.mxu1 %v2636_v48 }
 0x2ed   : > { %3296 = vmatpush3.msra.mxu1 %v2620_v19 }
 0x2ee   : > { %3297 = vmatprep.subr.mxu1 %v2635_v6 }
 0x2ef   : > { %3298 = vmatpush3.msra.mxu1 %v2619_v57 }
 0x2f0   : > { %3299 = vmatprep.subr.mxu1 %v2634_v31 }
 0x2f1   : > { %3300 = vmatpush3.msra.mxu1 %v2618_v40 }
 0x2f2   : > { %3301 = vmatprep.subr.mxu1 %v2633_v46 }
 0x2f3   : > { %3302 = vmatpush3.msra.mxu1 %v2617_v1 }
 0x2f4   : > { %3303 = vmatprep.subr.mxu1 %v2632_v29 }
 0x2f5   : > { %3304 = vmatpush3.msra.mxu1 %v2616_v14 }
 0x2f6   : > { %3305 = vmatprep.subr.mxu1 %v2631_v25 }
 0x2f7   : > { %3306 = vmatpush3.msra.mxu1 %v2615_v60 }
 0x2f8   : > { %3307 = vmatprep.subr.mxu1 %v2630_v51 }
 0x2f9   : > { %3308 = vmatpush3.msra.mxu1 %v2614_v28 }
 0x2fa   : > { %3309 = vmatprep.subr.mxu1 %v2629_v55 }
 0x2fb   : > { %3310 = vmatpush3.msra.mxu1 %v2613_v58 }
 0x2fc   : > { %3311 = vmatprep.subr.mxu1 %v2628_v17 }
 0x2fd   : > { %3312 = vmatpush3.msra.mxu1 %v2612_v54 }
 0x2fe   : > { %3313 = vmatprep.subr.mxu1 %v2627_v26 }
 0x2ff   : > { %3314 = vmatpush3.msra.mxu1 %v2611_v20 }
 0x300   : > { %3315 = vmatprep.subr.mxu1 %v2626_v45 }
 0x301   : > { %3316 = vmatpush3.msra.mxu1 %v2610_v23 }
 0x302   : > { %3317 = vmatprep.subr.mxu1 %v2625_v38 }
 0x303   : > { %3318 = vmatpush3.msra.mxu1 %v2609_v47 }
 0x304   : > { %3319 = vmatprep.subr.mxu1 %v2624_v4 }
 0x305   : > { %3320 = vmatpush3.msra.mxu1 %v2608_v27 }
 0x306   : > { %3321 = vmatprep.subr.mxu1 %v2623_v53 }
 0x307   : > { %3322 = vmatpush3.msra.mxu1 %v2607_v5 }
 0x308   : > { %2956 = vmatmul.mubr.f32.vlgmr.msra.gmra.mxu1 %v2668_v62 }
 0x388   : > { %v3218_v41 = vpop.f32.mrf.mxu1  ;;  %v3288_v22 = vpop.f32.mrf.mxu0 }
 0x38a   : > { %v3219_v50 = vpop.f32.mrf.mxu1  ;;  %v3289_v15 = vpop.f32.mrf.mxu0 }
 0x38b   : > { %v3220_v39 = vadd.f32 %v3219_v50, %v3218_v41  ;;  %v3290_v61 = vadd.f32 %v3289_v15, %v3288_v22 }
 0x38d   : > { %v2748_v33 = vadd.f32 %v3220_v39, %v2639_v11 }
 0x3a8   : > { %v3253_v21 = vpop.f32.mrf.mxu1 }
 0x3aa   : > { %v3254_v44 = vpop.f32.mrf.mxu1 }
 0x3ab   : > { %v3255_v34 = vadd.f32 %v3254_v44, %v3253_v21 }
 0x3ad   : > { %v2818_v36 = vadd.f32 %v3255_v34, %v2748_v33 }
 0x3af   : > { %v2888_v12 = vadd.f32 %v3290_v61, %v2818_v36 }
 0x3c8   : > { %v3323_v63 = vpop.f32.mrf.mxu1 }
 0x3ca   : > { %v3324_v18 = vpop.f32.mrf.mxu1 }
 0x3cb   : > { %v3325_v2 = vadd.f32 %v3324_v18, %v3323_v63 }
 0x3cd   : > { %v2958_v35 = vadd.f32 %v3325_v2, %v2888_v12 }
 0x3cf   : > { %v2964_v9 = vsel %vm2963_vm1, %v2958_v35, -1e+30 }
 0x3d0   : > { %v2966_v3 = vsel %vm2965_vm2, %v2964_v9, -inf }
 0x3d1   : > { %2967 = vmax.xlane.f32.xlu0 %v2966_v3 }
 0x45a   : > { %v2968_v10 = vpop.xlane.xlu0 %2967 }
 0x45b   : > { %v2969_v0 = vsub.f32 %v2964_v9, %v2968_v10 }
 0x45d   : > { %v2970_v43 = vmul.f32 1.442695, %v2969_v0 }
 0x45f   : > { %3434 = vpow2.f32 %v2970_v43 }
 0x46c   : > { %v3435_v13 = vpop.eup %3434 }
 0x46d   : > { %v2972_v7 = vsel %vm2965_vm2, %v3435_v13, 0.0 }
 0x46e   : > { %2973 = vadd.xlane.f32.xlu0 %v2972_v7 }
 0x4f7   : > { %v2974_v30 = vpop.xlane.xlu0 %2973 }
 0x4f8   : > { %3436 = vrcp.f32 %v2974_v30 }
 0x505   : > { %v3437_v24 = vpop.eup %3436 }
 0x506   : > { %v2976_v56 = vmul.f32 %v3437_v24, %v3435_v13 }
 0x508   : > { %2977 = vst [vmem:[%s293_s15] sm:$0x1] %v2976_v56 }
 0x509   : > { %3452 = shalt.err (!%p3449_p5)
}
 0x50a   : > { %s3453_s10 = scalar_lea.hbm %s2989_s19, 16  ;;  %s3457_s20 = scalar_lea.hbm %s5060_s7, 32 }
 0x50b   : > { %p3454_p6 = scmp.ne.s32.totalorder %s2989_s19, %s3453_s10  ;;  %p3458_p10 = scmp.lt.s32.totalorder %s2989_s19, %s5060_s7 }
 0x50c   : > { %p3459_p11 = scmp.lt.s32.totalorder %s3457_s20, %s3453_s10 }
 0x50d   : > { %p3455_p7 = pnand %p3454_p6, %p3600_p4 }
 0x50e   : > { %p3460_p12 = por %p3459_p11, %p3458_p10 }
 0x50f   : > { %p3456_p9 = pneg %p3455_p7 }
 0x511   : > { %p3461_p13 = pnand %p3460_p12, %p3456_p9 }
 0x513   : > { %3464 = shalt.err (!%p3461_p13)
}
 0x514   : > { %3360 = dma.vmem_to_hbm [thread:$0]  (%p3600_p4), %s2992_s16, 16, %s2989_s19, %s2979_s21  }
 0x515 PF: > { %p3366_p0 = scmp.ge.s32.totalorder %s3515_s29, 2  ;;  %s3003_s18 = sand.u32 1, %s3495_s24  }
 0x516   : > { %s3004_s22 = scalar_lea.sflag [#allocation4], %s3003_s18 }
 0x517   : > { %p3363_p1 = pnand %p3366_p0, %p3607_p8 }
 0x519   : > { %p3364_p2 = pneg %p3363_p1 }
 0x51b   : > { %3490 = dma.done.wait (%p3364_p2), %s3004_s22, 16  }
 0x51c   : > { %3492 = vsyncadd (%p3364_p2), %s3004_s22, 4294967280  ;;  %s20_s29 = sadd.s32 1, %s3515_s29   ;;  %s5082_s24 = smov %s3499_s25 }
 0x51d   : > { %p17_p3 = scmp.ge.s32.totalorder %s20_s29, 4   ;;  %s5083_s25 = smov %s3503_s26 }
 0x51e   : > { %s5084_s26 = smov %s3613_s14  ;;  %s5085_s27 = smov %s3511_s28 }
 0x51f   : > { %s5086_s28 = smov %s5088_s9  ;;  %19 = sbr.rel (!%p17_p3) target bundleno = 4 (0x4), region = 91 }
 0x524   :  { %3008 = vsyncpa [#allocation4], 1 }
 0x525   :  { %3010 = vsyncpa [#allocation4 + $0x1], 1 }

</bundles_post_ra>
